<compile_context>
chip_gen: v7x
topology: tpu7x:2x2x1
jax: 0.10.0
libtpu: 0.0.40
codegen_flags: <defaults>
</compile_context>

<pallas_src>
import numpy as np
import jax
import jax.numpy as jnp
from jax.experimental import pallas as pl
from jax.experimental.pallas import tpu as pltpu

EPS = 1e-5  # PyTorch nn.LayerNorm default eps

# Affine-slab column layout (values along sublanes, one parameter per lane):
#   cols 0..2   : layer-1 bias / gamma / beta   (H)
#   cols 3..5   : layer-2 bias / gamma / beta   (H/2)
#   cols 6..8   : layer-3 bias / gamma / beta   (H/4)
#   cols 9..11  : layer-4 bias / gamma / beta   (H/8)
#   col  12     : head weight (as a column)     (H/8)
#   col  13     : head bias (row 0)             (1)
_NCOL = 16  # padded


def _make_kernel(dims, compute_dtype):
    d0, d1, d2, d3, d4 = dims
    cdt = compute_dtype
    f32 = jnp.float32

    def ln_relu_t(y, g, b):
        # One-pass LayerNorm stats over the FEATURE axis (axis 0 in transposed
        # layout), kept in f32 to avoid cancellation.
        mu = jnp.mean(y, axis=0, keepdims=True)
        var = jnp.maximum(jnp.mean(y * y, axis=0, keepdims=True) - mu * mu, 0.0)
        return jnp.maximum((y - mu) * jax.lax.rsqrt(var + EPS) * g + b, 0.0)

    def kernel(x_ref, wbd_ref, w1_ref, w2_ref, w3_ref, w4_ref, aff_ref, out_ref):
        x = x_ref[...]                                          # (3n+2, tile_B), cdt
        # fused embedding: relu(block_diag(W_sel,W_B,W_u,W_t | b_emb) @ [x;1])
        h = jnp.maximum(
            jnp.dot(wbd_ref[...], x, preferred_element_type=f32), 0.0)  # (4E, tB) f32

        col = 0
        for w_ref, d in ((w1_ref, d1), (w2_ref, d2), (w3_ref, d3), (w4_ref, d4)):
            b = aff_ref[0:d, col:col + 1]
            g = aff_ref[0:d, col + 1:col + 2]
            be = aff_ref[0:d, col + 2:col + 3]
            h = jnp.dot(w_ref[...], h.astype(cdt), preferred_element_type=f32) + b
            h = ln_relu_t(h, g, be)
            col += 3

        # head: Linear(d4, 1) as a sublane reduction (keeps batch lane-dense),
        # then sigmoid, written as a (1, tile_B) lane-dense row.
        wh = aff_ref[0:d4, 12:13]
        bh = aff_ref[0:1, 13:14]
        logits = jnp.sum(h * wh, axis=0, keepdims=True) + bh
        out_ref[...] = jax.nn.sigmoid(logits)

    return kernel


# ---------------------------------------------------------------------------
# Parameter construction (mirrors the PyTorch __init__).
# ---------------------------------------------------------------------------

def make_params(key, num_items, embedding_dim, hidden_dim,
                init_value_z=12.0, randomize_affine=False):
    """PyTorch-layout parameters. randomize_affine=True gives nonzero biases /
    non-trivial LayerNorm affines so the correctness check exercises them
    (the real module zero-inits biases and uses gamma=1, beta=0)."""
    E, H, n = embedding_dim, hidden_dim, num_items
    dims = [4 * E, H, H // 2, H // 4, H // 8]
    ks = list(jax.random.split(key, 32))

    def xavier(k, o, i):
        bound = float(np.sqrt(6.0 / (i + o)))
        return jax.random.uniform(k, (o, i), jnp.float32, -bound, bound)

    def vec(k, d):
        if randomize_affine:
            return jax.random.uniform(k, (d,), jnp.float32, -0.5, 0.5)
        return jnp.zeros((d,), jnp.float32)

    def gamma(k, d):
        if randomize_affine:
            return jax.random.uniform(k, (d,), jnp.float32, 0.5, 1.5)
        return jnp.ones((d,), jnp.float32)

    P = {
        "num_items": n, "E": E, "dims": dims,
        "W_sel": xavier(ks[0], E, n), "b_sel": vec(ks[1], E),
        "W_B":   xavier(ks[2], E, 1), "b_B":   vec(ks[3], E),
        "W_u":   xavier(ks[4], E, n), "b_u":   vec(ks[5], E),
        "W_t":   xavier(ks[6], E, n), "b_t":   vec(ks[7], E),
        "W1": xavier(ks[8],  dims[1], dims[0]), "b1": vec(ks[9],  dims[1]),
        "g1": gamma(ks[10], dims[1]),           "be1": vec(ks[11], dims[1]),
        "W2": xavier(ks[12], dims[2], dims[1]), "b2": vec(ks[13], dims[2]),
        "g2": gamma(ks[14], dims[2]),           "be2": vec(ks[15], dims[2]),
        "W3": xavier(ks[16], dims[3], dims[2]), "b3": vec(ks[17], dims[3]),
        "g3": gamma(ks[18], dims[3]),           "be3": vec(ks[19], dims[3]),
        "W4": xavier(ks[20], dims[4], dims[3]), "b4": vec(ks[21], dims[4]),
        "g4": gamma(ks[22], dims[4]),           "be4": vec(ks[23], dims[4]),
        "Wh": xavier(ks[24], 1, dims[4]),       "b_h": vec(ks[25], 1),
        "log_z": jnp.float32(init_value_z),  # only used by compute_loss (not kernelized)
    }
    return P


def pack_kernel_params(P, compute_dtype=jnp.float32):
    """Block-diagonal fused embedding weight (with folded bias column) +
    coalesced affine slab."""
    n, E, dims = P["num_items"], P["E"], P["dims"]
    f_in = 3 * n + 2  # +1 constant-ones row carrying the folded embedding bias

    wbd = jnp.zeros((4 * E, f_in), jnp.float32)
    wbd = wbd.at[0:E,         0:n].set(P["W_sel"])
    wbd = wbd.at[E:2 * E,     n:n + 1].set(P["W_B"])
    wbd = wbd.at[2 * E:3 * E, n + 1:2 * n + 1].set(P["W_u"])
    wbd = wbd.at[3 * E:4 * E, 2 * n + 1:3 * n + 1].set(P["W_t"])
    b_emb = jnp.concatenate([P["b_sel"], P["b_B"], P["b_u"], P["b_t"]])
    wbd = wbd.at[:, 3 * n + 1].set(b_emb)          # folded bias (× ones row)

    rmax = max(dims)
    aff = jnp.zeros((rmax, _NCOL), jnp.float32)
    col = 0
    for k in (1, 2, 3, 4):
        d = dims[k]
        aff = aff.at[0:d, col].set(P[f"b{k}"])
        aff = aff.at[0:d, col + 1].set(P[f"g{k}"])
        aff = aff.at[0:d, col + 2].set(P[f"be{k}"])
        col += 3
    aff = aff.at[0:dims[4], 12].set(P["Wh"][0])
    aff = aff.at[0, 13].set(P["b_h"][0])

    cdt = compute_dtype
    return (wbd.astype(cdt), P["W1"].astype(cdt), P["W2"].astype(cdt),
            P["W3"].astype(cdt), P["W4"].astype(cdt), aff)


# ---------------------------------------------------------------------------
# Wrapper
# ---------------------------------------------------------------------------

def _round_up(x, m):
    return ((x + m - 1) // m) * m


def _default_compute_dtype():
    """bf16 matmul operands on v6e/v7x (bf16-native MXU), f32 on v5e and older."""
    try:
        kind = jax.devices()[0].device_kind.lower()
    except Exception:
        return jnp.float32
    if "v3" in kind or "v4" in kind or "v5" in kind:
        return jnp.float32
    return jnp.bfloat16


def _choose_tile(batch, requested):
    tile = min(int(requested), 8192)                        # v7x VMEM headroom; no gain past a few k lanes
    tile = min(tile, max(256, _round_up(batch, 256)))       # don't over-pad tiny batches
    if batch >= 512:
        tile = min(tile, _round_up(-(-batch // 2), 256))    # >=2 grid steps for v7x's 2 TCs
    return _round_up(tile, 256)                             # v6e/v7x MXU is 256 wide


def gflownet_forward(selected, remaining_B, u, t, P, *,
                     tile_B=2048, compute_dtype=None):
    if compute_dtype is None:
        compute_dtype = _default_compute_dtype()
    n, dims = P["num_items"], P["dims"]
    f_in = 3 * n + 2
    batch = selected.shape[0]
    tile = _choose_tile(batch, tile_B)
    assert tile % 256 == 0

    # concat (+ constant-ones row for the folded embedding bias) + transpose:
    # features on sublanes, batch on lanes. With allow_input_fusion these ops
    # are fused into the Pallas input DMA instead of materializing in HBM.
    ones = jnp.ones((batch, 1), jnp.float32)
    x = jnp.concatenate([selected, remaining_B, u, t, ones], axis=1).astype(jnp.float32)
    xT = x.T.astype(compute_dtype)                                  # (f_in, batch)
    b_pad = _round_up(batch, tile)
    if b_pad != batch:
        xT = jnp.pad(xT, ((0, 0), (0, b_pad - batch)))              # zero-pad tail

    wbd, w1, w2, w3, w4, aff = pack_kernel_params(P, compute_dtype)

    const = lambda a: pl.BlockSpec(a.shape, lambda i: (0, 0))       # resident weights
    out = pl.pallas_call(
        _make_kernel(dims, compute_dtype),
        out_shape=jax.ShapeDtypeStruct((1, b_pad), jnp.float32),
        grid=(b_pad // tile,),
        in_specs=[
            pl.BlockSpec((f_in, tile), lambda i: (0, i)),           # batched input
            const(wbd), const(w1), const(w2), const(w3), const(w4), const(aff),
        ],
        out_specs=pl.BlockSpec((1, tile), lambda i: (0, i)),        # lane-dense output
        compiler_params=pltpu.CompilerParams(
            dimension_semantics=("parallel",),
            vmem_limit_bytes=32 * 1024 * 1024,
            allow_input_fusion=[True, False, False, False, False, False, False],
        ),
    )(xT, wbd, w1, w2, w3, w4, aff)

    return out[0, :batch].reshape(batch, 1)                         # back to (B, 1)


# Pure-JAX reference (standard orientation, concat formulation, f32).
def reference_forward(selected, remaining_B, u, t, P):
    relu = lambda v: jnp.maximum(v, 0.0)
    sel_emb = relu(selected @ P["W_sel"].T + P["b_sel"])
    B_emb = relu(remaining_B @ P["W_B"].T + P["b_B"])
    u_emb = relu(u @ P["W_u"].T + P["b_u"])
    t_emb = relu(t @ P["W_t"].T + P["b_t"])
    h = jnp.concatenate([sel_emb, B_emb, u_emb, t_emb], axis=1)
    for k in (1, 2, 3, 4):
        h = h @ P[f"W{k}"].T + P[f"b{k}"]
        mu = h.mean(-1, keepdims=True)
        var = jnp.square(h - mu).mean(-1, keepdims=True)
        h = relu((h - mu) / jnp.sqrt(var + EPS) * P[f"g{k}"] + P[f"be{k}"])
    logits = h @ P["Wh"].T + P["b_h"]
    return jax.nn.sigmoid(logits)


# NOTE: generate_trajectories / compute_trajectory_log_prob_batch / compute_loss
# are sequential host-side training loops (Bernoulli sampling step by step);
# only the forward() hot path is kernelized here.
# TODO(synk): trajectory sampling loop (torch.distributions.Bernoulli) not kernelized.

if __name__ == "__main__":
    batch, num_items, embedding_dim, hidden_dim = 600, 8, 32, 64

    key = jax.random.PRNGKey(0)
    k1, k2, k3, k4, kp = jax.random.split(key, 5)
    selected = jnp.where(jax.random.bernoulli(k1, 0.5, (batch, num_items)),
                         1.0, -1.0).astype(jnp.float32)
    remaining_B = jax.random.uniform(k2, (batch, 1), jnp.float32, 0.0, 10.0)
    u = jax.random.uniform(k3, (batch, num_items), jnp.float32)
    t = jax.random.uniform(k4, (batch, num_items), jnp.float32)

    # random biases / LN affines so those code paths are actually checked
    P = make_params(kp, num_items, embedding_dim, hidden_dim, randomize_affine=True)
    ref = np.asarray(reference_forward(selected, remaining_B, u, t, P))

    # f32 path (tight tolerance); batch=600 -> tile 512, b_pad 1024, 2 grid steps
    out = gflownet_forward(selected, remaining_B, u, t, P,
                           compute_dtype=jnp.float32)
    out = np.asarray(jax.block_until_ready(out))
    assert out.shape == (batch, 1), out.shape
    if not np.allclose(out, ref, rtol=5e-4, atol=5e-4):
        raise SystemExit(f"f32 mismatch: max err {np.max(np.abs(out - ref))}")

    # bf16 matmul-operand path (loose tolerance; LN/sigmoid stats stay f32)
    out_bf = gflownet_forward(selected, remaining_B, u, t, P,
                              compute_dtype=jnp.bfloat16)
    out_bf = np.asarray(jax.block_until_ready(out_bf))
    if (not np.isfinite(out_bf).all()) or np.max(np.abs(out_bf - ref)) > 0.15:
        raise SystemExit(f"bf16 mismatch: max err {np.max(np.abs(out_bf - ref))}")

    print("KERNEL_OK")
</pallas_src>

<mosaic_0001>
module attributes {stable_mosaic.version = 11 : i64} {
  func.func @kernel(%arg0: i32, %arg1: memref<26x512xf32, #tpu.memory_space<vmem>>, %arg2: memref<128x26xf32, #tpu.memory_space<vmem>>, %arg3: memref<64x128xf32, #tpu.memory_space<vmem>>, %arg4: memref<32x64xf32, #tpu.memory_space<vmem>>, %arg5: memref<16x32xf32, #tpu.memory_space<vmem>>, %arg6: memref<8x16xf32, #tpu.memory_space<vmem>>, %arg7: memref<128x16xf32, #tpu.memory_space<vmem>>, %arg8: memref<1x512xf32, #tpu.memory_space<vmem>>) attributes {dimension_semantics = [#tpu.dimension_semantics<parallel>], iteration_bounds = array<i64: 2>, scalar_prefetch = 0 : i64, scratch_operands = 0 : i64, tpu.core_type = #tpu.core_type<tc>, window_params = [{transform_indices = @transform_0, window_bounds = array<i64: 26, 512>}, {pipeline_mode = #tpu.pipeline_mode<synchronous>, transform_indices = @transform_1, window_bounds = array<i64: 128, 26>}, {pipeline_mode = #tpu.pipeline_mode<synchronous>, transform_indices = @transform_2, window_bounds = array<i64: 64, 128>}, {pipeline_mode = #tpu.pipeline_mode<synchronous>, transform_indices = @transform_3, window_bounds = array<i64: 32, 64>}, {pipeline_mode = #tpu.pipeline_mode<synchronous>, transform_indices = @transform_4, window_bounds = array<i64: 16, 32>}, {pipeline_mode = #tpu.pipeline_mode<synchronous>, transform_indices = @transform_5, window_bounds = array<i64: 8, 16>}, {pipeline_mode = #tpu.pipeline_mode<synchronous>, transform_indices = @transform_6, window_bounds = array<i64: 128, 16>}, {transform_indices = @transform_7, window_bounds = array<i64: 1, 512>}]} {
    %c0 = arith.constant 0 : index
    %c0_0 = arith.constant 0 : index
    %0 = vector.load %arg1[%c0, %c0_0] : memref<26x512xf32, #tpu.memory_space<vmem>>, vector<26x512xf32>
    %c0_1 = arith.constant 0 : index
    %c0_2 = arith.constant 0 : index
    %1 = vector.load %arg2[%c0_1, %c0_2] : memref<128x26xf32, #tpu.memory_space<vmem>>, vector<128x26xf32>
    %cst = arith.constant dense<0.000000e+00> : vector<128x512xf32>
    %2 = tpu.matmul %1, %0, %cst {dimension_numbers = #tpu.dot_dimension_numbers<[1], [0], [0], [1], [0, 0, 1, 1], [], []>} : vector<128x26xf32>, vector<26x512xf32>, vector<128x512xf32> -> vector<128x512xf32>
    %cst_3 = arith.constant 0.000000e+00 : f32
    %3 = vector.broadcast %cst_3 : f32 to vector<128x512xf32>
    %4 = arith.maximumf %2, %3 : vector<128x512xf32>
    %c0_4 = arith.constant 0 : index
    %c0_5 = arith.constant 0 : index
    %5 = vector.load %arg7[%c0_4, %c0_5] : memref<128x16xf32, #tpu.memory_space<vmem>>, vector<64x1xf32>
    %c0_6 = arith.constant 0 : index
    %c1 = arith.constant 1 : index
    %6 = vector.load %arg7[%c0_6, %c1] : memref<128x16xf32, #tpu.memory_space<vmem>>, vector<64x1xf32>
    %c0_7 = arith.constant 0 : index
    %c2 = arith.constant 2 : index
    %7 = vector.load %arg7[%c0_7, %c2] : memref<128x16xf32, #tpu.memory_space<vmem>>, vector<64x1xf32>
    %c0_8 = arith.constant 0 : index
    %c0_9 = arith.constant 0 : index
    %8 = vector.load %arg3[%c0_8, %c0_9] : memref<64x128xf32, #tpu.memory_space<vmem>>, vector<64x128xf32>
    %cst_10 = arith.constant dense<0.000000e+00> : vector<64x512xf32>
    %9 = tpu.matmul %8, %4, %cst_10 {dimension_numbers = #tpu.dot_dimension_numbers<[1], [0], [0], [1], [0, 0, 1, 1], [], []>} : vector<64x128xf32>, vector<128x512xf32>, vector<64x512xf32> -> vector<64x512xf32>
    %10 = vector.broadcast %5 : vector<64x1xf32> to vector<64x512xf32>
    %11 = arith.addf %9, %10 : vector<64x512xf32>
    %cst_11 = arith.constant dense<0.000000e+00> : vector<512xf32>
    %12 = vector.multi_reduction <add>, %11, %cst_11 [0] : vector<64x512xf32> to vector<512xf32>
    %13 = vector.shape_cast %12 : vector<512xf32> to vector<1x512xf32>
    %cst_12 = arith.constant 6.400000e+01 : f32
    %14 = vector.broadcast %cst_12 : f32 to vector<1x512xf32>
    %15 = arith.divf %13, %14 : vector<1x512xf32>
    %16 = arith.mulf %11, %11 : vector<64x512xf32>
    %cst_13 = arith.constant dense<0.000000e+00> : vector<512xf32>
    %17 = vector.multi_reduction <add>, %16, %cst_13 [0] : vector<64x512xf32> to vector<512xf32>
    %18 = vector.shape_cast %17 : vector<512xf32> to vector<1x512xf32>
    %cst_14 = arith.constant 6.400000e+01 : f32
    %19 = vector.broadcast %cst_14 : f32 to vector<1x512xf32>
    %20 = arith.divf %18, %19 : vector<1x512xf32>
    %21 = arith.mulf %15, %15 : vector<1x512xf32>
    %22 = arith.subf %20, %21 : vector<1x512xf32>
    %cst_15 = arith.constant 0.000000e+00 : f32
    %23 = vector.broadcast %cst_15 : f32 to vector<1x512xf32>
    %24 = arith.maximumf %22, %23 : vector<1x512xf32>
    %25 = vector.broadcast %15 : vector<1x512xf32> to vector<64x512xf32>
    %26 = arith.subf %11, %25 : vector<64x512xf32>
    %cst_16 = arith.constant 9.99999974E-6 : f32
    %27 = vector.broadcast %cst_16 : f32 to vector<1x512xf32>
    %28 = arith.addf %24, %27 : vector<1x512xf32>
    %29 = math.rsqrt %28 : vector<1x512xf32>
    %30 = vector.broadcast %29 : vector<1x512xf32> to vector<64x512xf32>
    %31 = arith.mulf %26, %30 : vector<64x512xf32>
    %32 = vector.broadcast %6 : vector<64x1xf32> to vector<64x512xf32>
    %33 = arith.mulf %31, %32 : vector<64x512xf32>
    %34 = vector.broadcast %7 : vector<64x1xf32> to vector<64x512xf32>
    %35 = arith.addf %33, %34 : vector<64x512xf32>
    %cst_17 = arith.constant 0.000000e+00 : f32
    %36 = vector.broadcast %cst_17 : f32 to vector<64x512xf32>
    %37 = arith.maximumf %35, %36 : vector<64x512xf32>
    %c0_18 = arith.constant 0 : index
    %c3 = arith.constant 3 : index
    %38 = vector.load %arg7[%c0_18, %c3] : memref<128x16xf32, #tpu.memory_space<vmem>>, vector<32x1xf32>
    %c0_19 = arith.constant 0 : index
    %c4 = arith.constant 4 : index
    %39 = vector.load %arg7[%c0_19, %c4] : memref<128x16xf32, #tpu.memory_space<vmem>>, vector<32x1xf32>
    %c0_20 = arith.constant 0 : index
    %c5 = arith.constant 5 : index
    %40 = vector.load %arg7[%c0_20, %c5] : memref<128x16xf32, #tpu.memory_space<vmem>>, vector<32x1xf32>
    %c0_21 = arith.constant 0 : index
    %c0_22 = arith.constant 0 : index
    %41 = vector.load %arg4[%c0_21, %c0_22] : memref<32x64xf32, #tpu.memory_space<vmem>>, vector<32x64xf32>
    %cst_23 = arith.constant dense<0.000000e+00> : vector<32x512xf32>
    %42 = tpu.matmul %41, %37, %cst_23 {dimension_numbers = #tpu.dot_dimension_numbers<[1], [0], [0], [1], [0, 0, 1, 1], [], []>} : vector<32x64xf32>, vector<64x512xf32>, vector<32x512xf32> -> vector<32x512xf32>
    %43 = vector.broadcast %38 : vector<32x1xf32> to vector<32x512xf32>
    %44 = arith.addf %42, %43 : vector<32x512xf32>
    %cst_24 = arith.constant dense<0.000000e+00> : vector<512xf32>
    %45 = vector.multi_reduction <add>, %44, %cst_24 [0] : vector<32x512xf32> to vector<512xf32>
    %46 = vector.shape_cast %45 : vector<512xf32> to vector<1x512xf32>
    %cst_25 = arith.constant 3.200000e+01 : f32
    %47 = vector.broadcast %cst_25 : f32 to vector<1x512xf32>
    %48 = arith.divf %46, %47 : vector<1x512xf32>
    %49 = arith.mulf %44, %44 : vector<32x512xf32>
    %cst_26 = arith.constant dense<0.000000e+00> : vector<512xf32>
    %50 = vector.multi_reduction <add>, %49, %cst_26 [0] : vector<32x512xf32> to vector<512xf32>
    %51 = vector.shape_cast %50 : vector<512xf32> to vector<1x512xf32>
    %cst_27 = arith.constant 3.200000e+01 : f32
    %52 = vector.broadcast %cst_27 : f32 to vector<1x512xf32>
    %53 = arith.divf %51, %52 : vector<1x512xf32>
    %54 = arith.mulf %48, %48 : vector<1x512xf32>
    %55 = arith.subf %53, %54 : vector<1x512xf32>
    %cst_28 = arith.constant 0.000000e+00 : f32
    %56 = vector.broadcast %cst_28 : f32 to vector<1x512xf32>
    %57 = arith.maximumf %55, %56 : vector<1x512xf32>
    %58 = vector.broadcast %48 : vector<1x512xf32> to vector<32x512xf32>
    %59 = arith.subf %44, %58 : vector<32x512xf32>
    %cst_29 = arith.constant 9.99999974E-6 : f32
    %60 = vector.broadcast %cst_29 : f32 to vector<1x512xf32>
    %61 = arith.addf %57, %60 : vector<1x512xf32>
    %62 = math.rsqrt %61 : vector<1x512xf32>
    %63 = vector.broadcast %62 : vector<1x512xf32> to vector<32x512xf32>
    %64 = arith.mulf %59, %63 : vector<32x512xf32>
    %65 = vector.broadcast %39 : vector<32x1xf32> to vector<32x512xf32>
    %66 = arith.mulf %64, %65 : vector<32x512xf32>
    %67 = vector.broadcast %40 : vector<32x1xf32> to vector<32x512xf32>
    %68 = arith.addf %66, %67 : vector<32x512xf32>
    %cst_30 = arith.constant 0.000000e+00 : f32
    %69 = vector.broadcast %cst_30 : f32 to vector<32x512xf32>
    %70 = arith.maximumf %68, %69 : vector<32x512xf32>
    %c0_31 = arith.constant 0 : index
    %c6 = arith.constant 6 : index
    %71 = vector.load %arg7[%c0_31, %c6] : memref<128x16xf32, #tpu.memory_space<vmem>>, vector<16x1xf32>
    %c0_32 = arith.constant 0 : index
    %c7 = arith.constant 7 : index
    %72 = vector.load %arg7[%c0_32, %c7] : memref<128x16xf32, #tpu.memory_space<vmem>>, vector<16x1xf32>
    %c0_33 = arith.constant 0 : index
    %c8 = arith.constant 8 : index
    %73 = vector.load %arg7[%c0_33, %c8] : memref<128x16xf32, #tpu.memory_space<vmem>>, vector<16x1xf32>
    %c0_34 = arith.constant 0 : index
    %c0_35 = arith.constant 0 : index
    %74 = vector.load %arg5[%c0_34, %c0_35] : memref<16x32xf32, #tpu.memory_space<vmem>>, vector<16x32xf32>
    %cst_36 = arith.constant dense<0.000000e+00> : vector<16x512xf32>
    %75 = tpu.matmul %74, %70, %cst_36 {dimension_numbers = #tpu.dot_dimension_numbers<[1], [0], [0], [1], [0, 0, 1, 1], [], []>} : vector<16x32xf32>, vector<32x512xf32>, vector<16x512xf32> -> vector<16x512xf32>
    %76 = vector.broadcast %71 : vector<16x1xf32> to vector<16x512xf32>
    %77 = arith.addf %75, %76 : vector<16x512xf32>
    %cst_37 = arith.constant dense<0.000000e+00> : vector<512xf32>
    %78 = vector.multi_reduction <add>, %77, %cst_37 [0] : vector<16x512xf32> to vector<512xf32>
    %79 = vector.shape_cast %78 : vector<512xf32> to vector<1x512xf32>
    %cst_38 = arith.constant 1.600000e+01 : f32
    %80 = vector.broadcast %cst_38 : f32 to vector<1x512xf32>
    %81 = arith.divf %79, %80 : vector<1x512xf32>
    %82 = arith.mulf %77, %77 : vector<16x512xf32>
    %cst_39 = arith.constant dense<0.000000e+00> : vector<512xf32>
    %83 = vector.multi_reduction <add>, %82, %cst_39 [0] : vector<16x512xf32> to vector<512xf32>
    %84 = vector.shape_cast %83 : vector<512xf32> to vector<1x512xf32>
    %cst_40 = arith.constant 1.600000e+01 : f32
    %85 = vector.broadcast %cst_40 : f32 to vector<1x512xf32>
    %86 = arith.divf %84, %85 : vector<1x512xf32>
    %87 = arith.mulf %81, %81 : vector<1x512xf32>
    %88 = arith.subf %86, %87 : vector<1x512xf32>
    %cst_41 = arith.constant 0.000000e+00 : f32
    %89 = vector.broadcast %cst_41 : f32 to vector<1x512xf32>
    %90 = arith.maximumf %88, %89 : vector<1x512xf32>
    %91 = vector.broadcast %81 : vector<1x512xf32> to vector<16x512xf32>
    %92 = arith.subf %77, %91 : vector<16x512xf32>
    %cst_42 = arith.constant 9.99999974E-6 : f32
    %93 = vector.broadcast %cst_42 : f32 to vector<1x512xf32>
    %94 = arith.addf %90, %93 : vector<1x512xf32>
    %95 = math.rsqrt %94 : vector<1x512xf32>
    %96 = vector.broadcast %95 : vector<1x512xf32> to vector<16x512xf32>
    %97 = arith.mulf %92, %96 : vector<16x512xf32>
    %98 = vector.broadcast %72 : vector<16x1xf32> to vector<16x512xf32>
    %99 = arith.mulf %97, %98 : vector<16x512xf32>
    %100 = vector.broadcast %73 : vector<16x1xf32> to vector<16x512xf32>
    %101 = arith.addf %99, %100 : vector<16x512xf32>
    %cst_43 = arith.constant 0.000000e+00 : f32
    %102 = vector.broadcast %cst_43 : f32 to vector<16x512xf32>
    %103 = arith.maximumf %101, %102 : vector<16x512xf32>
    %c0_44 = arith.constant 0 : index
    %c9 = arith.constant 9 : index
    %104 = vector.load %arg7[%c0_44, %c9] : memref<128x16xf32, #tpu.memory_space<vmem>>, vector<8x1xf32>
    %c0_45 = arith.constant 0 : index
    %c10 = arith.constant 10 : index
    %105 = vector.load %arg7[%c0_45, %c10] : memref<128x16xf32, #tpu.memory_space<vmem>>, vector<8x1xf32>
    %c0_46 = arith.constant 0 : index
    %c11 = arith.constant 11 : index
    %106 = vector.load %arg7[%c0_46, %c11] : memref<128x16xf32, #tpu.memory_space<vmem>>, vector<8x1xf32>
    %c0_47 = arith.constant 0 : index
    %c0_48 = arith.constant 0 : index
    %107 = vector.load %arg6[%c0_47, %c0_48] : memref<8x16xf32, #tpu.memory_space<vmem>>, vector<8x16xf32>
    %cst_49 = arith.constant dense<0.000000e+00> : vector<8x512xf32>
    %108 = tpu.matmul %107, %103, %cst_49 {dimension_numbers = #tpu.dot_dimension_numbers<[1], [0], [0], [1], [0, 0, 1, 1], [], []>} : vector<8x16xf32>, vector<16x512xf32>, vector<8x512xf32> -> vector<8x512xf32>
    %109 = vector.broadcast %104 : vector<8x1xf32> to vector<8x512xf32>
    %110 = arith.addf %108, %109 : vector<8x512xf32>
    %cst_50 = arith.constant dense<0.000000e+00> : vector<512xf32>
    %111 = vector.multi_reduction <add>, %110, %cst_50 [0] : vector<8x512xf32> to vector<512xf32>
    %112 = vector.shape_cast %111 : vector<512xf32> to vector<1x512xf32>
    %cst_51 = arith.constant 8.000000e+00 : f32
    %113 = vector.broadcast %cst_51 : f32 to vector<1x512xf32>
    %114 = arith.divf %112, %113 : vector<1x512xf32>
    %115 = arith.mulf %110, %110 : vector<8x512xf32>
    %cst_52 = arith.constant dense<0.000000e+00> : vector<512xf32>
    %116 = vector.multi_reduction <add>, %115, %cst_52 [0] : vector<8x512xf32> to vector<512xf32>
    %117 = vector.shape_cast %116 : vector<512xf32> to vector<1x512xf32>
    %cst_53 = arith.constant 8.000000e+00 : f32
    %118 = vector.broadcast %cst_53 : f32 to vector<1x512xf32>
    %119 = arith.divf %117, %118 : vector<1x512xf32>
    %120 = arith.mulf %114, %114 : vector<1x512xf32>
    %121 = arith.subf %119, %120 : vector<1x512xf32>
    %cst_54 = arith.constant 0.000000e+00 : f32
    %122 = vector.broadcast %cst_54 : f32 to vector<1x512xf32>
    %123 = arith.maximumf %121, %122 : vector<1x512xf32>
    %124 = vector.broadcast %114 : vector<1x512xf32> to vector<8x512xf32>
    %125 = arith.subf %110, %124 : vector<8x512xf32>
    %cst_55 = arith.constant 9.99999974E-6 : f32
    %126 = vector.broadcast %cst_55 : f32 to vector<1x512xf32>
    %127 = arith.addf %123, %126 : vector<1x512xf32>
    %128 = math.rsqrt %127 : vector<1x512xf32>
    %129 = vector.broadcast %128 : vector<1x512xf32> to vector<8x512xf32>
    %130 = arith.mulf %125, %129 : vector<8x512xf32>
    %131 = vector.broadcast %105 : vector<8x1xf32> to vector<8x512xf32>
    %132 = arith.mulf %130, %131 : vector<8x512xf32>
    %133 = vector.broadcast %106 : vector<8x1xf32> to vector<8x512xf32>
    %134 = arith.addf %132, %133 : vector<8x512xf32>
    %cst_56 = arith.constant 0.000000e+00 : f32
    %135 = vector.broadcast %cst_56 : f32 to vector<8x512xf32>
    %136 = arith.maximumf %134, %135 : vector<8x512xf32>
    %c0_57 = arith.constant 0 : index
    %c12 = arith.constant 12 : index
    %137 = vector.load %arg7[%c0_57, %c12] : memref<128x16xf32, #tpu.memory_space<vmem>>, vector<8x1xf32>
    %c0_58 = arith.constant 0 : index
    %c13 = arith.constant 13 : index
    %138 = vector.load %arg7[%c0_58, %c13] : memref<128x16xf32, #tpu.memory_space<vmem>>, vector<1x1xf32>
    %139 = vector.broadcast %137 : vector<8x1xf32> to vector<8x512xf32>
    %140 = arith.mulf %136, %139 : vector<8x512xf32>
    %cst_59 = arith.constant dense<0.000000e+00> : vector<512xf32>
    %141 = vector.multi_reduction <add>, %140, %cst_59 [0] : vector<8x512xf32> to vector<512xf32>
    %142 = vector.shape_cast %141 : vector<512xf32> to vector<1x512xf32>
    %143 = vector.broadcast %138 : vector<1x1xf32> to vector<1x512xf32>
    %144 = arith.addf %142, %143 : vector<1x512xf32>
    %145 = arith.negf %144 : vector<1x512xf32>
    %146 = math.exp %145 : vector<1x512xf32>
    %cst_60 = arith.constant 1.000000e+00 : f32
    %147 = vector.broadcast %cst_60 : f32 to vector<1x512xf32>
    %148 = arith.addf %147, %146 : vector<1x512xf32>
    %149 = arith.divf %147, %148 : vector<1x512xf32>
    %c0_61 = arith.constant 0 : index
    %c0_62 = arith.constant 0 : index
    %150 = vector.load %arg8[%c0_61, %c0_62] : memref<1x512xf32, #tpu.memory_space<vmem>>, vector<1x512xf32>
    tpu.vector_store %arg8[%c0_61, %c0_62], %149 {strides = array<i32>} : memref<1x512xf32, #tpu.memory_space<vmem>>, vector<1x512xf32>,
    return
  }
  func.func @transform_0(%arg0: i32) -> (i32, i32) {
    %c0_i32 = arith.constant 0 : i32
    %c0_i32_0 = arith.constant 0 : i32
    return %c0_i32, %arg0 : i32, i32
  }
  func.func @transform_1(%arg0: i32) -> (i32, i32) {
    %c0_i32 = arith.constant 0 : i32
    %c0_i32_0 = arith.constant 0 : i32
    %c0_i32_1 = arith.constant 0 : i32
    return %c0_i32, %c0_i32_0 : i32, i32
  }
  func.func @transform_2(%arg0: i32) -> (i32, i32) {
    %c0_i32 = arith.constant 0 : i32
    %c0_i32_0 = arith.constant 0 : i32
    %c0_i32_1 = arith.constant 0 : i32
    return %c0_i32, %c0_i32_0 : i32, i32
  }
  func.func @transform_3(%arg0: i32) -> (i32, i32) {
    %c0_i32 = arith.constant 0 : i32
    %c0_i32_0 = arith.constant 0 : i32
    %c0_i32_1 = arith.constant 0 : i32
    return %c0_i32, %c0_i32_0 : i32, i32
  }
  func.func @transform_4(%arg0: i32) -> (i32, i32) {
    %c0_i32 = arith.constant 0 : i32
    %c0_i32_0 = arith.constant 0 : i32
    %c0_i32_1 = arith.constant 0 : i32
    return %c0_i32, %c0_i32_0 : i32, i32
  }
  func.func @transform_5(%arg0: i32) -> (i32, i32) {
    %c0_i32 = arith.constant 0 : i32
    %c0_i32_0 = arith.constant 0 : i32
    %c0_i32_1 = arith.constant 0 : i32
    return %c0_i32, %c0_i32_0 : i32, i32
  }
  func.func @transform_6(%arg0: i32) -> (i32, i32) {
    %c0_i32 = arith.constant 0 : i32
    %c0_i32_0 = arith.constant 0 : i32
    %c0_i32_1 = arith.constant 0 : i32
    return %c0_i32, %c0_i32_0 : i32, i32
  }
  func.func @transform_7(%arg0: i32) -> (i32, i32) {
    %c0_i32 = arith.constant 0 : i32
    %c0_i32_0 = arith.constant 0 : i32
    return %c0_i32, %arg0 : i32, i32
  }
}

</mosaic_0001>

<bundles_post_ra>
// kernel: tpu_custom_call.1
= control target key start
LH: loop header
LB: loop body
LE: loop exit
PB: predicated region body
PF: predicated region fallthrough
CT: control target
= control target key end

     0   :  { %12 = vsyncpa [#allocation4], 0  ;;  %s4447_s0 = inlined_call_operand.vmem [shape: f32[26,1024], index: 0, kind: input, shape index: {}]   ;;  %s4448_s1 = inlined_call_operand.vmem [shape: f32[128,26], index: 1, kind: input, shape index: {}]   ;;  %s4449_s2 = inlined_call_operand.hbm [shape: f32[64,128], index: 2, kind: input, shape index: {}]   ;;  %s4450_s3 = inlined_call_operand.vmem [shape: f32[32,64], index: 3, kind: input, shape index: {}]   ;;  %s4451_s4 = inlined_call_operand.hbm [shape: f32[16,32], index: 4, kind: input, shape index: {}]   ;;  %s4452_s5 = inlined_call_operand.vmem [shape: f32[8,16], index: 5, kind: input, shape index: {}]   ;;  %s4453_s6 = inlined_call_operand.vmem [shape: f32[128,16], index: 6, kind: input, shape index: {}]   ;;  %s4454_s7 = inlined_call_operand.hbm [shape: f32[1,1024], index: 7, kind: output, shape index: {}]  }
   0x1   :  { %13 = vsyncpa [#allocation7], 0 }
   0x2   :  { %14 = vsyncpa [#allocation5], 0 }
   0x3   :  { %16 = vsyncpa [#allocation5 + $0x1], 0  ;;  %s3308_s24 = smov 0   ;;  %s3310_s25 = smov 0  }
   0x4   :  { %s3312_s26 = smov 0   ;;  %s3314_s27 = smov 0  }
   0x5 LB: > { %s3329_s28 = sadd.s32 4294967295, %s3244_s27   ;;  %s2746_s29 = sadd.s32 4294967294, %s3244_s27   ;;  %s3244_s27 = sphi %s3314_s27, %s4498_s27   ;;  %s3240_s26 = sphi %s3312_s26, %s4502_s26   ;;  %s3236_s25 = sphi %s3310_s25, %s4501_s25   ;;  %s3232_s24 = sphi %s3308_s24, %s4500_s24  }
   0x6   : > { %s3333_s30 = sadd.s32 1, %s3244_s27   ;;  %s29_s8 = sadd.s32 1, %s3240_s26 }
   0x7   : > { %4467 = sst [smem:[#allocation12_spill]] %s3333_s30  ;;  %s26_s9 = ssub.s32 %s3244_s27, %s3333_s30 }
   0x8   : > { %p36_p0 = scmp.ne.s32.totalorder %s3240_s26, %s3236_s25  ;;  %p27_p1 = scmp.eq.s32.totalorder %s26_s9, 0 }
   0x9   : > { %p37_p2 = scmp.eq.s32.totalorder %s3244_s27, 0  ;;  %p192_p3 = scmp.eq.s32.totalorder %s3329_s28, 1 }
   0xa   : > { %p197_p4 = scmp.ne.s32.totalorder %s3236_s25, %s3232_s24  ;;  %p198_p7 = scmp.eq.s32.totalorder %s2746_s29, 1 }
   0xb   : > { %s3345_s10 = scalar_select %p27_p1, %s3240_s26, %s29_s8  }
   0xc   : > { %p3347_p5 = por %p37_p2, %p36_p0  ;;  %p3351_p6 = por %p192_p3, %p36_p0 }
   0xd   : > { %4468 = sst [smem:[#allocation13_spill]] %s3345_s10  ;;  %p2747_p8 = scmp.ge.s32.totalorder %s3244_s27, 1 }
   0xe   : > { %s4469_s11 = scalar_select %p3347_p5, 1, 0 }
   0xf   : > { %s4470_s12 = scalar_select %p3351_p6, 1, 0 }
  0x10   : > { %p205_p9 = scmp.lt.s32.totalorder %s3244_s27, 3  ;;  %p3357_p10 = por %p198_p7, %p197_p4 }
  0x11   : > { %p4455_p11 = scmp.eq.s32.totalorder %s3329_s28, 0  ;;  %s3246_s15 = smov [#allocation3]  }
  0x12   : > { %s4471_s13 = scalar_select %p3357_p10, 1, 0 }
  0x13   : > { %p3362_p12 = pnand %p2747_p8, %p205_p9  ;;  %s220_s16 = sshll.u32 %s3246_s15, 4  ;;  %s221_s16 = int_to_ptr.vmem [resolvable:$true] %s220_s16 }
  0x14   : > { %s3247_s18 = smov [#allocation6]   ;;  %s3118_s22 = scalar_lea.hbm %s4449_s2, 1024 }
  0x15   : > { %s4472_s14 = scalar_select %p3362_p12, 1, 0 }
  0x16   : > { %p2970_p13 = pneg %p3362_p12  ;;  %s236_s19 = sshll.u32 %s3247_s18, 4  ;;  %s3374_s19 = int_to_ptr.vmem [resolvable:$true] %s236_s19 }
  0x17   : > { %p3119_p1 = scmp.ne.s32.totalorder %s4449_s2, %s3118_s22  ;;  %p3125_p7 = scmp.lt.u32.totalorder %s3118_s22, %s4449_s2 }
  0x18   : > { %p3370_p0 = pnand %p4455_p11, %p2970_p13 }
  0x1a   : > { %p3120_p2 = pneg %p3370_p0 }
  0x1c   : > { %p3121_p3 = pnand %p3120_p2, %p3119_p1 }
  0x1e   : > { %p3122_p4 = pneg %p3121_p3 }
  0x20   : > { %p3127_p8 = pnand %p3125_p7, %p3122_p4 }
  0x22   : > { %3130 = shalt.err (!%p3127_p8)
}
  0x23   : > { %s3131_s15 = scalar_lea.vmem %s221_s16, 1024  ;;  %p3139_p10 = scmp.lt.s32.totalorder %s221_s16, %s221_s16 }
  0x24   : > { %p3132_p9 = scmp.ne.s32.totalorder %s221_s16, %s3131_s15  ;;  %p3140_p6 = scmp.lt.s32.totalorder %s3131_s15, %s3131_s15 }
  0x26   : > { %p3134_p13 = pnand %p3132_p9, %p3120_p2  ;;  %p3141_p12 = por %p3140_p6, %p3139_p10 }
  0x28   : > { %p3135_p11 = pneg %p3134_p13 }
  0x2a   : > { %p3142_p5 = pnand %p3141_p12, %p3135_p11 }
  0x2c   : > { %3145 = shalt.err (!%p3142_p5)
}
  0x2d   : > { %s3248_s18 = smov 128   ;;  %s3249_s20 = smov 8  }
  0x2e   : > { %2973 = dma.hbm_to_vmem [thread:$0]  (!%p3370_p0), %s4449_s2, 1024, %s221_s16, [#allocation4], %s3248_s18, %s3248_s18, %s3249_s20  }
  0x2f   : > { %s3146_s8 = scalar_lea.hbm %s4451_s4, 256 }
  0x30   : > { %p3147_p1 = scmp.ne.s32.totalorder %s4451_s4, %s3146_s8  ;;  %p3153_p10 = scmp.lt.u32.totalorder %s3146_s8, %s4451_s4 }
  0x32   : > { %p3149_p5 = pnand %p3147_p1, %p3120_p2 }
  0x34   : > { %p3150_p6 = pneg %p3149_p5 }
  0x36   : > { %p3155_p11 = pnand %p3153_p10, %p3150_p6 }
  0x38   : > { %3158 = shalt.err (!%p3155_p11)
}
  0x39   : > { %s3159_s16 = scalar_lea.vmem %s3374_s19, 256  ;;  %p3167_p7 = scmp.lt.s32.totalorder %s3374_s19, %s3374_s19 }
  0x3a   : > { %p3160_p12 = scmp.ne.s32.totalorder %s3374_s19, %s3159_s16  ;;  %p3168_p8 = scmp.lt.s32.totalorder %s3159_s16, %s3159_s16 }
  0x3c   : > { %p3162_p3 = pnand %p3160_p12, %p3120_p2  ;;  %p3169_p9 = por %p3168_p8, %p3167_p7 }
  0x3e   : > { %p3163_p4 = pneg %p3162_p3 }
  0x40   : > { %p3170_p13 = pnand %p3169_p9, %p3163_p4 }
  0x42   : > { %3173 = shalt.err (!%p3170_p13)
}
  0x43   : > { %2976 = dma.hbm_to_vmem [thread:$0]  (!%p3370_p0), %s4451_s4, 256, %s3374_s19, [#allocation7], %s3248_s18, %s3248_s18, %s3249_s20  }
  0x44   : > { %p2750_p1 = scmp.ge.s32.totalorder %s3244_s27, 2 }
  0x45   : > { %p4474_p2 = scmp.ne.s32.totalorder (!%p2750_p1), %s4469_s11, 0 }
  0x46   : > { %252 = sbr.rel (%p2750_p1) target bundleno = 89 (0x59), region = 40 }
  0x4d   : > { %255 = sbr.rel (!%p4474_p2) target bundleno = 89 (0x59), region = 44  ;;  %s257_s21 = sand.u32 (%p4474_p2), 1, %s3240_s26  }
  0x4e   : > { %s2818_s22 = sshll.u32 (%p4474_p2), %s3244_s27, 5  ;;  %s2751_s23 = sshll.u32 (%p4474_p2), %s257_s21, 7 }
  0x4f   : > { %s3433_s8 = scalar_lea.vmem (%p4474_p2), %s4447_s0, %s2818_s22  ;;  %s259_s11 = scalar_lea.vmem (%p4474_p2), [#allocation2], %s2751_s23 }
  0x50   : > { %v275_v0 = vld [vmem:[%s3433_s8] sm:$0xff] (%p4474_p2)  ;;  %v277_v1 = vld [vmem:[%s3433_s8 + $0x8] sm:$0xff] (%p4474_p2)  ;;  %v279_v2 = vld [vmem:[%s3433_s8 + $0x10] sm:$0xff] (%p4474_p2) }
  0x51   : > { %276 = vst [vmem:[%s259_s11] sm:$0xff] (%p4474_p2), %v275_v0  ;;  %278 = vst [vmem:[%s259_s11 + $0x8] sm:$0xff] (%p4474_p2), %v277_v1  ;;  %v281_v3 = vld [vmem:[%s3433_s8 + $0x18] sm:$0xff] (%p4474_p2)  ;;  %v283_v4 = vld [vmem:[%s3433_s8 + $0x40] sm:$0xff] (%p4474_p2) }
  0x52   : > { %280 = vst [vmem:[%s259_s11 + $0x10] sm:$0xff] (%p4474_p2), %v279_v2  ;;  %v285_v5 = vld [vmem:[%s3433_s8 + $0x48] sm:$0xff] (%p4474_p2)  ;;  %282 = vst [vmem:[%s259_s11 + $0x18] sm:$0xff] (%p4474_p2), %v281_v3  ;;  %v287_v6 = vld [vmem:[%s3433_s8 + $0x50] sm:$0xff] (%p4474_p2) }
  0x53   : > { %284 = vst [vmem:[%s259_s11 + $0x20] sm:$0xff] (%p4474_p2), %v283_v4  ;;  %286 = vst [vmem:[%s259_s11 + $0x28] sm:$0xff] (%p4474_p2), %v285_v5  ;;  %v289_v7 = vld [vmem:[%s3433_s8 + $0x58] sm:$0xff] (%p4474_p2)  ;;  %v291_v8 = vld [vmem:[%s3433_s8 + $0x80] sm:$0xff] (%p4474_p2) }
  0x54   : > { %288 = vst [vmem:[%s259_s11 + $0x30] sm:$0xff] %v287_v6  ;;  %290 = vst [vmem:[%s259_s11 + $0x38] sm:$0xff] %v289_v7  ;;  %v293_v9 = vld [vmem:[%s3433_s8 + $0x88] sm:$0xff]  ;;  %v295_v10 = vld [vmem:[%s3433_s8 + $0x90] sm:$0xff] }
  0x55   : > { %292 = vst [vmem:[%s259_s11 + $0x40] sm:$0xff] %v291_v8  ;;  %v297_v11 = vld [vmem:[%s3433_s8 + $0x98] sm:$0xff]  ;;  %294 = vst [vmem:[%s259_s11 + $0x48] sm:$0xff] %v293_v9  ;;  %v299_v12 = vld [vmem:[%s3433_s8 + $0xc0] sm:$0xff] }
  0x56   : > { %296 = vst [vmem:[%s259_s11 + $0x50] sm:$0xff] %v295_v10  ;;  %298 = vst [vmem:[%s259_s11 + $0x58] sm:$0xff] %v297_v11  ;;  %v301_v13 = vld [vmem:[%s3433_s8 + $0xc8] sm:$0xff]  ;;  %v303_v14 = vld [vmem:[%s3433_s8 + $0xd0] sm:$0xff] }
  0x57   : > { %300 = vst [vmem:[%s259_s11 + $0x60] sm:$0xff] %v299_v12  ;;  %302 = vst [vmem:[%s259_s11 + $0x68] sm:$0xff] %v301_v13  ;;  %v305_v15 = vld [vmem:[%s3433_s8 + $0xd8] sm:$0xff] }
  0x58   : > { %304 = vst [vmem:[%s259_s11 + $0x70] sm:$0xff] %v303_v14  ;;  %306 = vst [vmem:[%s259_s11 + $0x78] sm:$0xff] %v305_v15 }
  0x59 PF: > { %p4475_p0 = scmp.ne.s32.totalorder %s4472_s14, 0 }
  0x5b   : > { %315 = sbr.rel (%p4475_p0) target bundleno = 1604 (0x644), region = 67 }
  0x62   : > { %s3454_s19 = sand.u32 1, %s3236_s25   ;;  %p4476_p5 = scmp.eq.s32.totalorder %s3329_s28, 0 }
  0x63   : > { %s2755_s18 = sshll.u32 %s3454_s19, 7 }
  0x64   : > { %s3457_s20 = scalar_lea.vmem [#allocation2], %s2755_s18 }
  0x65   : > { %3219 = dma.done.wait (%p4476_p5), [#allocation4], 1024   ;;  %p4477_p6 = pmov %p4476_p5 }
  0x66   : > { %p4478_p10 = pmov %p4476_p5 }
  0x67   : > { %3221 = vsyncadd (%p4477_p6), [#allocation4], 4294966272 }
  0x68   : > { %3223 = dma.done.wait (%p4478_p10), [#allocation7], 256   ;;  %p4479_p11 = pmov %p4476_p5 }
  0x69   : > { %v4460_v16 = vmov 0.0   ;;  %vm440_vm0 = vcmask 1041408   ;;  %vm3251_vm1 = vmmov 1   ;;  %v360_v18 = vld [vmem:[%s3457_s20 + $0x8] sm:$0xff]  ;;  %v362_v20 = vld [vmem:[%s3457_s20 + $0x18] sm:$0xff]  ;;  %v359_v23 = vld [vmem:[%s3457_s20] sm:$0xff] }
  0x6a   : > { %3225 = vsyncadd (%p4479_p11), [#allocation7], 4294967040  ;;  %517 = vmatprep.mubr.f32.mxu0 %v4460_v16  ;;  %678 = vmatprep.mubr.f32.mxu1 %v4460_v16  ;;  %v364_v19 = vld [vmem:[%s3457_s20 + $0x28] sm:$0xff]  ;;  %v366_v22 = vld [vmem:[%s3457_s20 + $0x38] sm:$0xff]  ;;  %vm391_vm3 = vcmask 211968   ;;  %v3252_v60 = vmov 0  }
  0x6b   : > { %vm3469_vm2 = vmpackc.low %vm440_vm0, %vm3251_vm1  ;;  %v2820_v21 = vpack.c.bf16 %v364_v19, %v360_v18  ;;  %v363_v24 = vld [vmem:[%s3457_s20 + $0x20] sm:$0xff]  ;;  %v2830_v25 = vpack.c.bf16 %v366_v22, %v362_v20  ;;  %v361_v27 = vld [vmem:[%s3457_s20 + $0x10] sm:$0xff]  ;;  %3039 = vset.pattern.permute.xlu0 %v3252_v60  ;;  %3040 = vset.pattern.permute.xlu1 %v3252_v60  ;;  %v3253_v3 = vmov 1   ;;  %v3254_v4 = vmov 2   ;;  %s2758_s21 = sshll.u32 %s3454_s19, 2  ;;  %s2819_s22 = sshll.u32 %s3329_s28, 6 }
  0x6c   : > { %v2822_v26 = vpack.c.bf16 %v363_v24, %v359_v23  ;;  %v365_v28 = vld [vmem:[%s3457_s20 + $0x30] sm:$0xff]  ;;  %v368_v29 = vld [vmem:[%s3457_s20 + $0x48] sm:$0xff]  ;;  %v370_v32 = vld [vmem:[%s3457_s20 + $0x58] sm:$0xff]  ;;  %vm1538_vm4 = vcmask 523264   ;;  %vm1972_vm5 = vcmask 261120   ;;  %vm2289_vm6 = vcmask 130048   ;;  %s4403_s11 = scalar_lea.hbm %s4454_s7, %s2819_s22 }
  0x6d   : > { %2821 = vmatprep.subr.bf16.mxu0 %v2820_v21  ;;  %v2832_v30 = vpack.c.bf16 %v365_v28, %v361_v27  ;;  %v372_v31 = vld [vmem:[%s3457_s20 + $0x68] sm:$0x3]  ;;  %v374_v33 = vld [vmem:[%s3457_s20 + $0x78] sm:$0x3]  ;;  %2831 = vmatprep.subr.bf16.mxu1 %v2830_v25  ;;  %v367_v36 = vld [vmem:[%s3457_s20 + $0x40] sm:$0xff]  ;;  %s356_s23 = scalar_lea.vmem [#allocation8], %s2758_s21 }
  0x6e   : > { %2823 = vmatpush1.bf16.msra.mxu0 %v2822_v26  ;;  %v2824_v34 = vpack.c.bf16 %v372_v31, %v368_v29  ;;  %v2834_v35 = vpack.c.bf16 %v374_v33, %v370_v32  ;;  %v371_v37 = vld [vmem:[%s3457_s20 + $0x60] sm:$0x3]  ;;  %v369_v38 = vld [vmem:[%s3457_s20 + $0x50] sm:$0xff]  ;;  %v376_v43 = vld [vmem:[%s4448_s1 + $0x8] sm:$0xff]  ;;  %s2659_s29 = sshll.u32 %s356_s23, 4  ;;  %s2645_s18 = scalar_lea.sflag [#allocation5], %s3454_s19  ;;  %s4405_s29 = int_to_ptr.vmem [resolvable:$true] %s2659_s29 }
  0x6f   : > { %2833 = vmatpush1.bf16.msra.mxu1 %v2832_v30  ;;  %v2827_v39 = vpack.c.bf16 %v371_v37, %v367_v36  ;;  %v373_v40 = vld [vmem:[%s3457_s20 + $0x70] sm:$0x3]  ;;  %v375_v42 = vld [vmem:[%s4448_s1] sm:$0xff]  ;;  %v378_v45 = vld [vmem:[%s4448_s1 + $0x18] sm:$0xff]  ;;  %s3174_s20 = scalar_lea.vmem %s4405_s29, 64  ;;  %p4496_p3 = scmp.ne.s32.totalorder %s4470_s12, 0 }
  0x70   : > { %2826 = vmatprep.subr.msk.bf16.mxu0 %vm3469_vm2, %v2824_v34  ;;  %2836 = vmatprep.subr.msk.bf16.mxu1 %vm3469_vm2, %v2834_v35  ;;  %v2837_v41 = vpack.c.bf16 %v373_v40, %v369_v38  ;;  %v377_v44 = vld [vmem:[%s4448_s1 + $0x10] sm:$0xff]  ;;  %v379_v46 = vld [vmem:[%s4448_s1 + $0x20] sm:$0xff]  ;;  %v380_v47 = vld [vmem:[%s4448_s1 + $0x28] sm:$0xff]  ;;  %p3175_p12 = scmp.ne.s32.totalorder %s4405_s29, %s3174_s20  ;;  %s3267_s28 = smov [#allocation8]  }
  0x71   : > { %v381_v48 = vld [vmem:[%s4448_s1 + $0x30] sm:$0xff]  ;;  %v382_v49 = vld [vmem:[%s4448_s1 + $0x38] sm:$0xff]  ;;  %v383_v50 = vld [vmem:[%s4448_s1 + $0x40] sm:$0xff]  ;;  %s3178_s14 = sshll.u32 %s3267_s28, 4  ;;  %s3179_s14 = int_to_ptr.vmem [resolvable:$false] %s3178_s14 }
  0x72   : > { %2829 = vmatpush1.bf16.msk.msra.mxu0 %vm3469_vm2, %v2827_v39  ;;  %v384_v51 = vld [vmem:[%s4448_s1 + $0x48] sm:$0xff]  ;;  %v385_v52 = vld [vmem:[%s4448_s1 + $0x50] sm:$0xff]  ;;  %v386_v53 = vld [vmem:[%s4448_s1 + $0x58] sm:$0xff]  ;;  %p3176_p4 = pnand %p3175_p12, %p4496_p3  ;;  %s3180_s9 = scalar_lea.vmem %s3179_s14, 128 }
  0x73   : > { %2839 = vmatpush1.bf16.msk.msra.mxu1 %vm3469_vm2, %v2837_v41  ;;  %v387_v54 = vld [vmem:[%s4448_s1 + $0x60] sm:$0xff]  ;;  %v388_v55 = vld [vmem:[%s4448_s1 + $0x68] sm:$0xff]  ;;  %v389_v56 = vld [vmem:[%s4448_s1 + $0x70] sm:$0xff]  ;;  %p3181_p8 = scmp.lt.s32.totalorder %s4405_s29, %s3179_s14  ;;  %p3182_p9 = scmp.lt.s32.totalorder %s3180_s9, %s3174_s20 }
  0x74   : > { %v390_v57 = vld [vmem:[%s4448_s1 + $0x78] sm:$0xff]  ;;  %v839_v58 = vld [vmem:[%s4453_s6] sm:$0xff]  ;;  %v3615_v59 = vld [vmem:[%s4453_s6 + $0x10] sm:$0xff]  ;;  %p3177_p7 = pneg %p3176_p4 }
  0x75   : > { %2761 = vmatmul.mubr.msk.f32.vlgmr.msra.gmra.mrb[0].mxu0 %vm391_vm3, %v375_v42  ;;  %857 = vperm.xlu0 %3039, %v839_v58   ;;  %v3621_v61 = vld [vmem:[%s4453_s6 + $0x8] sm:$0xff]  ;;  %v3626_v62 = vld [vmem:[%s4453_s6 + $0x18] sm:$0xff]  ;;  %v3633_v63 = vld [vmem:[%s4453_s6 + $0x20] sm:$0xff]  ;;  %p3183_p13 = por %p3182_p9, %p3181_p8 }
  0x76   : > { %2779 = vmatmul.mubr.msk.f32.vlgmr.msra.gmra.mrb[0].mxu1 %vm391_vm3, %v375_v42  ;;  %523 = vmatprep.mubr.f32.mxu0 %v4460_v16  ;;  %v3638_v0 = vld [vmem:[%s4453_s6 + $0x28] sm:$0xff]  ;;  %v3645_v1 = vld [vmem:[%s4453_s6 + $0x30] sm:$0xff]  ;;  %v3650_v2 = vld [vmem:[%s4453_s6 + $0x38] sm:$0xff] }
  0x77   : > { %684 = vmatprep.mubr.f32.mxu1 %v4460_v16  ;;  %867 = vperm.xlu1 %3040, %v3615_v59   ;;  %p3184_p2 = pnand %p3183_p13, %p3177_p7 }
  0x79   : > { %2762 = vmatmul.mubr.msk.f32.gmra.mrb[2].mxu0 %vm391_vm3, %v376_v43  ;;  %862 = vperm.xlu0 %3039, %v3621_v61  }
  0x7a   : > { %2780 = vmatmul.mubr.msk.f32.gmra.mrb[2].mxu1 %vm391_vm3, %v376_v43  ;;  %529 = vmatprep.mubr.f32.mxu0 %v4460_v16 }
  0x7b   : > { %690 = vmatprep.mubr.f32.mxu1 %v4460_v16  ;;  %872 = vperm.xlu1 %3040, %v3626_v62  }
  0x7d   : > { %2763 = vmatmul.mubr.msk.f32.gmra.mrb[4].mxu0 %vm391_vm3, %v377_v44  ;;  %877 = vperm.xlu0 %3039, %v3633_v63  }
  0x7e   : > { %2781 = vmatmul.mubr.msk.f32.gmra.mrb[4].mxu1 %vm391_vm3, %v377_v44  ;;  %535 = vmatprep.mubr.f32.mxu0 %v4460_v16 }
  0x7f   : > { %696 = vmatprep.mubr.f32.mxu1 %v4460_v16  ;;  %882 = vperm.xlu1 %3040, %v3638_v0  }
  0x81   : > { %2764 = vmatmul.mubr.msk.f32.gmra.mrb[6].mxu0 %vm391_vm3, %v378_v45  ;;  %887 = vperm.xlu0 %3039, %v3645_v1  }
  0x82   : > { %2782 = vmatmul.mubr.msk.f32.gmra.mrb[6].mxu1 %vm391_vm3, %v378_v45  ;;  %541 = vmatprep.mubr.f32.mxu0 %v4460_v16 }
  0x83   : > { %702 = vmatprep.mubr.f32.mxu1 %v4460_v16  ;;  %892 = vperm.xlu1 %3040, %v3650_v2  }
  0x85   : > { %2765 = vmatmul.mubr.msk.f32.gmra.mrb[8].mxu0 %vm391_vm3, %v379_v46  ;;  %3041 = vset.pattern.permute.xlu0 %v3253_v3 }
  0x86   : > { %2783 = vmatmul.mubr.msk.f32.gmra.mrb[8].mxu1 %vm391_vm3, %v379_v46  ;;  %547 = vmatprep.mubr.f32.mxu0 %v4460_v16 }
  0x87   : > { %708 = vmatprep.mubr.f32.mxu1 %v4460_v16  ;;  %3042 = vset.pattern.permute.xlu1 %v3253_v3 }
  0x88   : > { %1355 = vperm.xlu1 %3042, %v3621_v61   ;;  %1351 = vperm.xlu0 %3041, %v839_v58  }
  0x89   : > { %2766 = vmatmul.mubr.msk.f32.gmra.mrb[10].mxu0 %vm391_vm3, %v380_v47 }
  0x8a   : > { %2784 = vmatmul.mubr.msk.f32.gmra.mrb[10].mxu1 %vm391_vm3, %v380_v47  ;;  %553 = vmatprep.mubr.f32.mxu0 %v4460_v16 }
  0x8b   : > { %714 = vmatprep.mubr.f32.mxu1 %v4460_v16 }
  0x8c   : > { %3043 = vset.pattern.permute.xlu1 %v3254_v4  ;;  %1367 = vperm.xlu0 %3041, %v3633_v63  }
  0x8d   : > { %2767 = vmatmul.mubr.msk.f32.gmra.mrb[12].mxu0 %vm391_vm3, %v381_v48  ;;  %1415 = vperm.xlu1 %3043, %v839_v58  }
  0x8e   : > { %2785 = vmatmul.mubr.msk.f32.gmra.mrb[12].mxu1 %vm391_vm3, %v381_v48  ;;  %559 = vmatprep.mubr.f32.mxu0 %v4460_v16 }
  0x8f   : > { %720 = vmatprep.mubr.f32.mxu1 %v4460_v16 }
  0x90   : > { %3046 = vset.pattern.permute.xlu0 %v3254_v4 }
  0x91   : > { %2768 = vmatmul.mubr.msk.f32.gmra.mrb[14].mxu0 %vm391_vm3, %v382_v49  ;;  %3044 = vset.pattern.permute.xlu1 %v3253_v3 }
  0x92   : > { %2786 = vmatmul.mubr.msk.f32.gmra.mrb[14].mxu1 %vm391_vm3, %v382_v49  ;;  %565 = vmatprep.mubr.f32.mxu0 %v4460_v16 }
  0x93   : > { %726 = vmatprep.mubr.f32.mxu1 %v4460_v16  ;;  %1419 = vperm.xlu0 %3046, %v3621_v61  }
  0x94   : > { %1359 = vperm.xlu1 %3044, %v3615_v59  }
  0x95   : > { %2769 = vmatmul.mubr.msk.f32.gmra.mrb[16].mxu0 %vm391_vm3, %v383_v50 }
  0x96   : > { %2787 = vmatmul.mubr.msk.f32.gmra.mrb[16].mxu1 %vm391_vm3, %v383_v50  ;;  %571 = vmatprep.mubr.f32.mxu0 %v4460_v16 }
  0x97   : > { %732 = vmatprep.mubr.f32.mxu1 %v4460_v16  ;;  %1423 = vperm.xlu0 %3046, %v3615_v59  }
  0x98   : > { %1363 = vperm.xlu1 %3044, %v3626_v62  }
  0x99   : > { %2770 = vmatmul.mubr.msk.f32.gmra.mrb[18].mxu0 %vm391_vm3, %v384_v51 }
  0x9a   : > { %2788 = vmatmul.mubr.msk.f32.gmra.mrb[18].mxu1 %vm391_vm3, %v384_v51  ;;  %577 = vmatprep.mubr.f32.mxu0 %v4460_v16 }
  0x9b   : > { %738 = vmatprep.mubr.f32.mxu1 %v4460_v16  ;;  %1435 = vperm.xlu0 %3046, %v3638_v0  }
  0x9c   : > { %3045 = vset.pattern.permute.xlu1 %v3254_v4 }
  0x9d   : > { %2771 = vmatmul.mubr.msk.f32.gmra.mrb[20].mxu0 %vm391_vm3, %v385_v52  ;;  %1427 = vperm.xlu1 %3045, %v3626_v62  }
  0x9e   : > { %2789 = vmatmul.mubr.msk.f32.gmra.mrb[20].mxu1 %vm391_vm3, %v385_v52  ;;  %583 = vmatprep.mubr.f32.mxu0 %v4460_v16 }
  0x9f   : > { %744 = vmatprep.mubr.f32.mxu1 %v4460_v16  ;;  %1439 = vperm.xlu0 %3046, %v3645_v1  }
  0xa1   : > { %2772 = vmatmul.mubr.msk.f32.gmra.mrb[22].mxu0 %vm391_vm3, %v386_v53  ;;  %3047 = vset.pattern.permute.xlu1 %v3253_v3 }
  0xa2   : > { %2790 = vmatmul.mubr.msk.f32.gmra.mrb[22].mxu1 %vm391_vm3, %v386_v53  ;;  %589 = vmatprep.mubr.f32.mxu0 %v4460_v16 }
  0xa3   : > { %750 = vmatprep.mubr.f32.mxu1 %v4460_v16  ;;  %1371 = vperm.xlu1 %3047, %v3638_v0  }
  0xa5   : > { %2773 = vmatmul.mubr.msk.f32.gmra.mrb[24].mxu0 %vm391_vm3, %v387_v54 }
  0xa6   : > { %2791 = vmatmul.mubr.msk.f32.gmra.mrb[24].mxu1 %vm391_vm3, %v387_v54  ;;  %595 = vmatprep.mubr.f32.mxu0 %v4460_v16 }
  0xa7   : > { %756 = vmatprep.mubr.f32.mxu1 %v4460_v16  ;;  %3048 = vset.pattern.permute.xlu1 %v3254_v4 }
  0xa8   : > { %1431 = vperm.xlu1 %3048, %v3633_v63  }
  0xa9   : > { %2774 = vmatmul.mubr.msk.f32.gmra.mrb[26].mxu0 %vm391_vm3, %v388_v55 }
  0xaa   : > { %2792 = vmatmul.mubr.msk.f32.gmra.mrb[26].mxu1 %vm391_vm3, %v388_v55  ;;  %601 = vmatprep.mubr.f32.mxu0 %v4460_v16 }
  0xab   : > { %762 = vmatprep.mubr.f32.mxu1 %v4460_v16 }
  0xac   : > { %3049 = vset.pattern.permute.xlu1 %v3253_v3 }
  0xad   : > { %2775 = vmatmul.mubr.msk.f32.gmra.mrb[28].mxu0 %vm391_vm3, %v389_v56  ;;  %1375 = vperm.xlu1 %3049, %v3645_v1  }
  0xae   : > { %2793 = vmatmul.mubr.msk.f32.gmra.mrb[28].mxu1 %vm391_vm3, %v389_v56  ;;  %607 = vmatprep.mubr.f32.mxu0 %v4460_v16 }
  0xaf   : > { %768 = vmatprep.mubr.f32.mxu1 %v4460_v16 }
  0xb1   : > { %2776 = vmatmul.mubr.msk.f32.gmra.mrb[30].mxu0 %vm391_vm3, %v390_v57  ;;  %1379 = vperm.xlu1 %3049, %v3650_v2  }
  0xb2   : > { %2794 = vmatmul.mubr.msk.f32.gmra.mrb[30].mxu1 %vm391_vm3, %v390_v57  ;;  %959 = vmatprep.mubr.f32.mxu0 %v4460_v16 }
  0xb3   : > { %1072 = vmatprep.mubr.f32.mxu1 %v4460_v16 }
  0xb5   : > { %3050 = vset.pattern.permute.xlu1 %v3254_v4 }
  0xb6   : > { %1443 = vperm.xlu1 %3050, %v3650_v2  }
 0x148   : > { %v519_v5 = vpop.f32.mrb[0].mxu0 }
 0x149   : > { %v680_v6 = vpop.f32.mrb[0].mxu1  ;;  %v521_v7 = vpop.f32.mrb[1].mxu0  ;;  %v775_v10 = vmax.f32 %v519_v5, 0.0 }
 0x14a   : > { %v682_v8 = vpop.f32.mrb[1].mxu1  ;;  %v777_v14 = vmax.f32 %v680_v6, 0.0  ;;  %v776_v15 = vmax.f32 %v521_v7, 0.0 }
 0x14b   : > { %v778_v20 = vmax.f32 %v682_v8, 0.0 }
 0x14c   : > { %v525_v9 = vpop.f32.mrb[2].mxu0 }
 0x14d   : > { %v779_v11 = vmax.f32 %v525_v9, 0.0  ;;  %v686_v12 = vpop.f32.mrb[2].mxu1  ;;  %v527_v13 = vpop.f32.mrb[3].mxu0 }
 0x14e   : > { %v781_v17 = vmax.f32 %v686_v12, 0.0  ;;  %v780_v18 = vmax.f32 %v527_v13, 0.0  ;;  %v688_v19 = vpop.f32.mrb[3].mxu1 }
 0x14f   : > { %v2842_v21 = vpack.c.bf16 %v779_v11, %v775_v10  ;;  %v782_v22 = vmax.f32 %v688_v19, 0.0 }
 0x150   : > { %v2874_v23 = vpack.c.bf16 %v781_v17, %v777_v14  ;;  %v2840_v24 = vpack.c.bf16 %v780_v18, %v776_v15  ;;  %v531_v25 = vpop.f32.mrb[4].mxu0 }
 0x151   : > { %v2872_v26 = vpack.c.bf16 %v782_v22, %v778_v20  ;;  %v692_v27 = vpop.f32.mrb[4].mxu1  ;;  %v533_v28 = vpop.f32.mrb[5].mxu0  ;;  %v783_v31 = vmax.f32 %v531_v25, 0.0 }
 0x152   : > { %v694_v29 = vpop.f32.mrb[5].mxu1  ;;  %2841 = vmatprep.subr.bf16.mxu0 %v2840_v24  ;;  %v785_v35 = vmax.f32 %v692_v27, 0.0  ;;  %v784_v36 = vmax.f32 %v533_v28, 0.0 }
 0x153   : > { %2873 = vmatprep.subr.bf16.mxu1 %v2872_v26  ;;  %2843 = vmatpush1.bf16.msra.mxu0 %v2842_v21  ;;  %v786_v40 = vmax.f32 %v694_v29, 0.0 }
 0x154   : > { %2875 = vmatpush1.bf16.msra.mxu1 %v2874_v23  ;;  %v537_v30 = vpop.f32.mrb[6].mxu0 }
 0x155   : > { %v787_v32 = vmax.f32 %v537_v30, 0.0  ;;  %v698_v33 = vpop.f32.mrb[6].mxu1  ;;  %v539_v34 = vpop.f32.mrb[7].mxu0 }
 0x156   : > { %v789_v37 = vmax.f32 %v698_v33, 0.0  ;;  %v788_v38 = vmax.f32 %v539_v34, 0.0  ;;  %v700_v39 = vpop.f32.mrb[7].mxu1 }
 0x157   : > { %v2846_v41 = vpack.c.bf16 %v787_v32, %v783_v31  ;;  %v790_v42 = vmax.f32 %v700_v39, 0.0 }
 0x158   : > { %v2878_v43 = vpack.c.bf16 %v789_v37, %v785_v35  ;;  %v2844_v44 = vpack.c.bf16 %v788_v38, %v784_v36  ;;  %v543_v45 = vpop.f32.mrb[8].mxu0 }
 0x159   : > { %v2876_v46 = vpack.c.bf16 %v790_v42, %v786_v40  ;;  %v704_v47 = vpop.f32.mrb[8].mxu1  ;;  %v545_v48 = vpop.f32.mrb[9].mxu0  ;;  %v791_v51 = vmax.f32 %v543_v45, 0.0 }
 0x15a   : > { %v706_v49 = vpop.f32.mrb[9].mxu1  ;;  %2845 = vmatprep.subr.bf16.mxu0 %v2844_v44  ;;  %v793_v55 = vmax.f32 %v704_v47, 0.0  ;;  %v792_v56 = vmax.f32 %v545_v48, 0.0 }
 0x15b   : > { %2877 = vmatprep.subr.bf16.mxu1 %v2876_v46  ;;  %2847 = vmatpush1.bf16.msra.mxu0 %v2846_v41  ;;  %v794_v0 = vmax.f32 %v706_v49, 0.0 }
 0x15c   : > { %2879 = vmatpush1.bf16.msra.mxu1 %v2878_v43  ;;  %v549_v50 = vpop.f32.mrb[10].mxu0 }
 0x15d   : > { %v795_v52 = vmax.f32 %v549_v50, 0.0  ;;  %v710_v53 = vpop.f32.mrb[10].mxu1  ;;  %v551_v54 = vpop.f32.mrb[11].mxu0 }
 0x15e   : > { %v797_v57 = vmax.f32 %v710_v53, 0.0  ;;  %v796_v58 = vmax.f32 %v551_v54, 0.0  ;;  %v712_v60 = vpop.f32.mrb[11].mxu1 }
 0x15f   : > { %v2850_v5 = vpack.c.bf16 %v795_v52, %v791_v51  ;;  %v798_v6 = vmax.f32 %v712_v60, 0.0 }
 0x160   : > { %v2882_v7 = vpack.c.bf16 %v797_v57, %v793_v55  ;;  %v2848_v8 = vpack.c.bf16 %v796_v58, %v792_v56  ;;  %v555_v9 = vpop.f32.mrb[12].mxu0 }
 0x161   : > { %v2880_v10 = vpack.c.bf16 %v798_v6, %v794_v0  ;;  %v716_v11 = vpop.f32.mrb[12].mxu1  ;;  %v557_v63 = vpop.f32.mrb[13].mxu0  ;;  %v799_v14 = vmax.f32 %v555_v9, 0.0 }
 0x162   : > { %v718_v12 = vpop.f32.mrb[13].mxu1  ;;  %2849 = vmatprep.subr.bf16.mxu0 %v2848_v8  ;;  %v801_v19 = vmax.f32 %v716_v11, 0.0  ;;  %v800_v20 = vmax.f32 %v557_v63, 0.0 }
 0x163   : > { %2881 = vmatprep.subr.bf16.mxu1 %v2880_v10  ;;  %2851 = vmatpush1.bf16.msra.mxu0 %v2850_v5  ;;  %v802_v23 = vmax.f32 %v718_v12, 0.0 }
 0x164   : > { %2883 = vmatpush1.bf16.msra.mxu1 %v2882_v7  ;;  %v561_v13 = vpop.f32.mrb[14].mxu0 }
 0x165   : > { %v803_v15 = vmax.f32 %v561_v13, 0.0  ;;  %v722_v17 = vpop.f32.mrb[14].mxu1  ;;  %v563_v18 = vpop.f32.mrb[15].mxu0 }
 0x166   : > { %v805_v3 = vmax.f32 %v722_v17, 0.0  ;;  %v804_v21 = vmax.f32 %v563_v18, 0.0  ;;  %v724_v22 = vpop.f32.mrb[15].mxu1 }
 0x167   : > { %v2854_v24 = vpack.c.bf16 %v803_v15, %v799_v14  ;;  %v806_v1 = vmax.f32 %v724_v22, 0.0 }
 0x168   : > { %v2886_v25 = vpack.c.bf16 %v805_v3, %v801_v19  ;;  %v2852_v26 = vpack.c.bf16 %v804_v21, %v800_v20  ;;  %v567_v27 = vpop.f32.mrb[16].mxu0 }
 0x169   : > { %v2884_v28 = vpack.c.bf16 %v806_v1, %v802_v23  ;;  %v728_v29 = vpop.f32.mrb[16].mxu1  ;;  %v569_v30 = vpop.f32.mrb[17].mxu0  ;;  %v807_v33 = vmax.f32 %v567_v27, 0.0 }
 0x16a   : > { %v730_v31 = vpop.f32.mrb[17].mxu1  ;;  %2853 = vmatprep.subr.bf16.mxu0 %v2852_v26  ;;  %v809_v37 = vmax.f32 %v728_v29, 0.0  ;;  %v808_v38 = vmax.f32 %v569_v30, 0.0 }
 0x16b   : > { %2885 = vmatprep.subr.bf16.mxu1 %v2884_v28  ;;  %2855 = vmatpush1.bf16.msra.mxu0 %v2854_v24  ;;  %v810_v42 = vmax.f32 %v730_v31, 0.0 }
 0x16c   : > { %2887 = vmatpush1.bf16.msra.mxu1 %v2886_v25  ;;  %v573_v32 = vpop.f32.mrb[18].mxu0 }
 0x16d   : > { %v811_v34 = vmax.f32 %v573_v32, 0.0  ;;  %v734_v35 = vpop.f32.mrb[18].mxu1  ;;  %v575_v36 = vpop.f32.mrb[19].mxu0 }
 0x16e   : > { %v813_v39 = vmax.f32 %v734_v35, 0.0  ;;  %v812_v40 = vmax.f32 %v575_v36, 0.0  ;;  %v736_v41 = vpop.f32.mrb[19].mxu1 }
 0x16f   : > { %v2858_v43 = vpack.c.bf16 %v811_v34, %v807_v33  ;;  %v814_v4 = vmax.f32 %v736_v41, 0.0 }
 0x170   : > { %v2890_v44 = vpack.c.bf16 %v813_v39, %v809_v37  ;;  %v2856_v45 = vpack.c.bf16 %v812_v40, %v808_v38  ;;  %v579_v46 = vpop.f32.mrb[20].mxu0 }
 0x171   : > { %v2888_v2 = vpack.c.bf16 %v814_v4, %v810_v42  ;;  %v740_v47 = vpop.f32.mrb[20].mxu1  ;;  %v581_v48 = vpop.f32.mrb[21].mxu0  ;;  %v815_v51 = vmax.f32 %v579_v46, 0.0 }
 0x172   : > { %v742_v49 = vpop.f32.mrb[21].mxu1  ;;  %2857 = vmatprep.subr.bf16.mxu0 %v2856_v45  ;;  %v817_v55 = vmax.f32 %v740_v47, 0.0  ;;  %v816_v56 = vmax.f32 %v581_v48, 0.0  ;;  %v848_v47 = vld [vmem:[#allocation3 + $0x8] sm:$0xff]  ;;  %v849_v48 = vld [vmem:[#allocation3 + $0x10] sm:$0xff] }
 0x173   : > { %2889 = vmatprep.subr.bf16.mxu1 %v2888_v2  ;;  %2859 = vmatpush1.bf16.msra.mxu0 %v2858_v43  ;;  %v818_v0 = vmax.f32 %v742_v49, 0.0  ;;  %v847_v2 = vld [vmem:[#allocation3] sm:$0xff]  ;;  %v850_v49 = vld [vmem:[#allocation3 + $0x18] sm:$0xff] }
 0x174   : > { %2891 = vmatpush1.bf16.msra.mxu1 %v2890_v44  ;;  %v585_v50 = vpop.f32.mrb[22].mxu0 }
 0x175   : > { %v819_v52 = vmax.f32 %v585_v50, 0.0  ;;  %v746_v53 = vpop.f32.mrb[22].mxu1  ;;  %v587_v54 = vpop.f32.mrb[23].mxu0  ;;  %v851_v50 = vld [vmem:[#allocation3 + $0x20] sm:$0xff] }
 0x176   : > { %v821_v57 = vmax.f32 %v746_v53, 0.0  ;;  %v820_v58 = vmax.f32 %v587_v54, 0.0  ;;  %v748_v60 = vpop.f32.mrb[23].mxu1  ;;  %v854_v53 = vld [vmem:[#allocation3 + $0x38] sm:$0xff]  ;;  %v858_v54 = vpop.permute.xlu0 %857 }
 0x177   : > { %v2862_v5 = vpack.c.bf16 %v819_v52, %v815_v51  ;;  %v822_v6 = vmax.f32 %v748_v60, 0.0  ;;  %v852_v51 = vld [vmem:[#allocation3 + $0x28] sm:$0xff]  ;;  %v853_v52 = vld [vmem:[#allocation3 + $0x30] sm:$0xff] }
 0x178   : > { %v2894_v7 = vpack.c.bf16 %v821_v57, %v817_v55  ;;  %v2860_v8 = vpack.c.bf16 %v820_v58, %v816_v56  ;;  %v591_v9 = vpop.f32.mrb[24].mxu0  ;;  %v3697_v55 = vld [vmem:[%s4453_s6] sm:$0xff]  ;;  %v3255_v57 = vmov 3  }
 0x179   : > { %v2892_v10 = vpack.c.bf16 %v822_v6, %v818_v0  ;;  %v752_v11 = vpop.f32.mrb[24].mxu1  ;;  %v593_v63 = vpop.f32.mrb[25].mxu0  ;;  %v823_v14 = vmax.f32 %v591_v9, 0.0  ;;  %4482 = vst [vmem:[#allocation14_spill] sm:$0xff] %v3697_v55  ;;  %3052 = vset.pattern.permute.xlu1 %v3255_v57  ;;  %3051 = vset.pattern.permute.xlu0 %v3255_v57 }
 0x17a   : > { %v754_v12 = vpop.f32.mrb[25].mxu1  ;;  %2861 = vmatprep.subr.bf16.mxu0 %v2860_v8  ;;  %v825_v19 = vmax.f32 %v752_v11, 0.0  ;;  %v824_v20 = vmax.f32 %v593_v63, 0.0  ;;  %1525 = vperm.xlu1 %3052, %v3621_v61   ;;  %v863_v8 = vpop.permute.xlu0 %862 }
 0x17b   : > { %2893 = vmatprep.subr.bf16.mxu1 %v2892_v10  ;;  %2863 = vmatpush1.bf16.msra.mxu0 %v2862_v5  ;;  %v826_v23 = vmax.f32 %v754_v12, 0.0 }
 0x17c   : > { %2895 = vmatpush1.bf16.msra.mxu1 %v2894_v7  ;;  %v597_v13 = vpop.f32.mrb[26].mxu0  ;;  %1520 = vperm.xlu0 %3051, %v3697_v55  }
 0x17d   : > { %v827_v15 = vmax.f32 %v597_v13, 0.0  ;;  %v758_v17 = vpop.f32.mrb[26].mxu1  ;;  %v599_v18 = vpop.f32.mrb[27].mxu0 }
 0x17e   : > { %v829_v3 = vmax.f32 %v758_v17, 0.0  ;;  %v828_v21 = vmax.f32 %v599_v18, 0.0  ;;  %v760_v22 = vpop.f32.mrb[27].mxu1  ;;  %1530 = vperm.xlu1 %3052, %v3615_v59   ;;  %v868_v18 = vpop.permute.xlu1 %867 }
 0x17f   : > { %v2866_v24 = vpack.c.bf16 %v827_v15, %v823_v14  ;;  %v830_v1 = vmax.f32 %v760_v22, 0.0 }
 0x180   : > { %v2898_v25 = vpack.c.bf16 %v829_v3, %v825_v19  ;;  %v2864_v26 = vpack.c.bf16 %v828_v21, %v824_v20  ;;  %v603_v27 = vpop.f32.mrb[28].mxu0  ;;  %1535 = vperm.xlu0 %3051, %v3626_v62  }
 0x181   : > { %v2896_v28 = vpack.c.bf16 %v830_v1, %v826_v23  ;;  %v764_v29 = vpop.f32.mrb[28].mxu1  ;;  %v605_v30 = vpop.f32.mrb[29].mxu0  ;;  %v831_v33 = vmax.f32 %v603_v27, 0.0 }
 0x182   : > { %v766_v31 = vpop.f32.mrb[29].mxu1  ;;  %2865 = vmatprep.subr.bf16.mxu0 %v2864_v26  ;;  %v833_v37 = vmax.f32 %v764_v29, 0.0  ;;  %v832_v38 = vmax.f32 %v605_v30, 0.0 }
 0x183   : > { %2897 = vmatprep.subr.bf16.mxu1 %v2896_v28  ;;  %2867 = vmatpush1.bf16.msra.mxu0 %v2866_v24  ;;  %v834_v42 = vmax.f32 %v766_v31, 0.0 }
 0x184   : > { %2899 = vmatpush1.bf16.msra.mxu1 %v2898_v25  ;;  %v609_v32 = vpop.f32.mrb[30].mxu0 }
 0x185   : > { %v835_v34 = vmax.f32 %v609_v32, 0.0  ;;  %v770_v35 = vpop.f32.mrb[30].mxu1  ;;  %v611_v36 = vpop.f32.mrb[31].mxu0 }
 0x186   : > { %v837_v39 = vmax.f32 %v770_v35, 0.0  ;;  %v836_v40 = vmax.f32 %v611_v36, 0.0  ;;  %v772_v41 = vpop.f32.mrb[31].mxu1 }
 0x187   : > { %v2870_v43 = vpack.c.bf16 %v835_v34, %v831_v33  ;;  %v838_v4 = vmax.f32 %v772_v41, 0.0  ;;  %v3256_v34 = vmov 4  }
 0x188   : > { %v2902_v44 = vpack.c.bf16 %v837_v39, %v833_v37  ;;  %v2868_v45 = vpack.c.bf16 %v836_v40, %v832_v38  ;;  %3053 = vset.pattern.permute.xlu1 %v3256_v34  ;;  %3054 = vset.pattern.permute.xlu0 %v3256_v34 }
 0x189   : > { %v2900_v46 = vpack.c.bf16 %v838_v4, %v834_v42  ;;  %1879 = vperm.xlu1 %3053, %v3697_v55   ;;  %1883 = vperm.xlu0 %3054, %v3621_v61  }
 0x18a   : > { %2869 = vmatprep.subr.bf16.mxu0 %v2868_v45  ;;  %v873_v45 = vpop.permute.xlu1 %872 }
 0x18b   : > { %2901 = vmatprep.subr.bf16.mxu1 %v2900_v46  ;;  %2871 = vmatpush1.bf16.msra.mxu0 %v2870_v43 }
 0x18c   : > { %2903 = vmatpush1.bf16.msra.mxu1 %v2902_v44 }
 0x18d   : > { %1887 = vperm.xlu0 %3054, %v3615_v59  }
 0x18e   : > { %960 = vmatmul.mubr.f32.vlgmr.msra.gmra.mrb[32].mxu0 %v847_v2 }
 0x18f   : > { %1073 = vmatmul.mubr.f32.vlgmr.msra.gmra.mrb[32].mxu1 %v847_v2  ;;  %965 = vmatprep.mubr.f32.mxu0 %v4460_v16 }
 0x190   : > { %1078 = vmatprep.mubr.f32.mxu1 %v4460_v16 }
 0x192   : > { %966 = vmatmul.mubr.f32.gmra.mrb[34].mxu0 %v848_v47 }
 0x193   : > { %1079 = vmatmul.mubr.f32.gmra.mrb[34].mxu1 %v848_v47  ;;  %971 = vmatprep.mubr.f32.mxu0 %v4460_v16 }
 0x194   : > { %1084 = vmatprep.mubr.f32.mxu1 %v4460_v16 }
 0x196   : > { %972 = vmatmul.mubr.f32.gmra.mrb[36].mxu0 %v849_v48 }
 0x197   : > { %1085 = vmatmul.mubr.f32.gmra.mrb[36].mxu1 %v849_v48  ;;  %977 = vmatprep.mubr.f32.mxu0 %v4460_v16 }
 0x198   : > { %1090 = vmatprep.mubr.f32.mxu1 %v4460_v16 }
 0x19a   : > { %978 = vmatmul.mubr.f32.gmra.mrb[38].mxu0 %v850_v49 }
 0x19b   : > { %1091 = vmatmul.mubr.f32.gmra.mrb[38].mxu1 %v850_v49  ;;  %983 = vmatprep.mubr.f32.mxu0 %v4460_v16 }
 0x19c   : > { %1096 = vmatprep.mubr.f32.mxu1 %v4460_v16 }
 0x19e   : > { %984 = vmatmul.mubr.f32.gmra.mrb[40].mxu0 %v851_v50 }
 0x19f   : > { %1097 = vmatmul.mubr.f32.gmra.mrb[40].mxu1 %v851_v50  ;;  %989 = vmatprep.mubr.f32.mxu0 %v4460_v16 }
 0x1a0   : > { %1102 = vmatprep.mubr.f32.mxu1 %v4460_v16 }
 0x1a2   : > { %990 = vmatmul.mubr.f32.gmra.mrb[42].mxu0 %v852_v51 }
 0x1a3   : > { %1103 = vmatmul.mubr.f32.gmra.mrb[42].mxu1 %v852_v51  ;;  %995 = vmatprep.mubr.f32.mxu0 %v4460_v16 }
 0x1a4   : > { %1108 = vmatprep.mubr.f32.mxu1 %v4460_v16 }
 0x1a6   : > { %996 = vmatmul.mubr.f32.gmra.mrb[44].mxu0 %v853_v52 }
 0x1a7   : > { %1109 = vmatmul.mubr.f32.gmra.mrb[44].mxu1 %v853_v52  ;;  %1001 = vmatprep.mubr.f32.mxu0 %v4460_v16 }
 0x1a8   : > { %1114 = vmatprep.mubr.f32.mxu1 %v4460_v16 }
 0x1aa   : > { %1002 = vmatmul.mubr.f32.gmra.mrb[46].mxu0 %v854_v53 }
 0x1ab   : > { %1115 = vmatmul.mubr.f32.gmra.mrb[46].mxu1 %v854_v53  ;;  %1615 = vmatprep.mubr.f32.mxu0 %v4460_v16 }
 0x1ac   : > { %1704 = vmatprep.mubr.f32.mxu1 %v4460_v16 }
 0x261   : > { %v961_v56 = vpop.f32.mrb[32].mxu0 }
 0x262   : > { %v3699_v58 = vadd.f32 %v961_v56, %v858_v54  ;;  %v1074_v60 = vpop.f32.mrb[32].mxu1  ;;  %v963_v0 = vpop.f32.mrb[33].mxu0 }
 0x263   : > { %v3703_v5 = vadd.f32 %v1074_v60, %v858_v54  ;;  %v3705_v6 = vadd.f32 %v963_v0, %v858_v54  ;;  %v1076_v7 = vpop.f32.mrb[33].mxu1 }
 0x264   : > { %v3707_v9 = vadd.f32 %v1076_v7, %v858_v54  ;;  %v1178_v11 = vmul.f32 %v3699_v58, %v3699_v58  ;;  %v3257_v7 = vmov 5  }
 0x265   : > { %v967_v10 = vpop.f32.mrb[34].mxu0  ;;  %v1180_v14 = vmul.f32 %v3703_v5, %v3703_v5  ;;  %v1179_v15 = vmul.f32 %v3705_v6, %v3705_v6  ;;  %3055 = vset.pattern.permute.xlu1 %v3257_v7  ;;  %3057 = vset.pattern.permute.xlu0 %v3257_v7 }
 0x266   : > { %v3711_v63 = vadd.f32 %v967_v10, %v863_v8  ;;  %v1080_v12 = vpop.f32.mrb[34].mxu1  ;;  %v969_v13 = vpop.f32.mrb[35].mxu0  ;;  %v1181_v3 = vmul.f32 %v3707_v9, %v3707_v9  ;;  %1911 = vperm.xlu1 %3055, %v3697_v55   ;;  %1919 = vperm.xlu0 %3057, %v3615_v59  }
 0x267   : > { %v3719_v17 = vadd.f32 %v1080_v12, %v863_v8  ;;  %v3721_v19 = vadd.f32 %v969_v13, %v863_v8  ;;  %v1082_v20 = vpop.f32.mrb[35].mxu1  ;;  %v878_v13 = vpop.permute.xlu0 %877 }
 0x268   : > { %v1121_v21 = vadd.f32 %v3711_v63, %v3699_v58  ;;  %v1182_v22 = vmul.f32 %v3711_v63, %v3711_v63  ;;  %v3729_v23 = vadd.f32 %v1082_v20, %v863_v8 }
 0x269   : > { %v1147_v24 = vadd.f32 %v3719_v17, %v3703_v5  ;;  %v1184_v1 = vmul.f32 %v3719_v17, %v3719_v17  ;;  %v1134_v25 = vadd.f32 %v3721_v19, %v3705_v6  ;;  %v1183_v26 = vmul.f32 %v3721_v19, %v3721_v19  ;;  %v973_v27 = vpop.f32.mrb[36].mxu0 }
 0x26a   : > { %v1210_v28 = vadd.f32 %v1182_v22, %v1178_v11  ;;  %v1160_v29 = vadd.f32 %v3729_v23, %v3707_v9  ;;  %v1185_v30 = vmul.f32 %v3729_v23, %v3729_v23  ;;  %v3743_v31 = vadd.f32 %v973_v27, %v868_v18  ;;  %v1086_v32 = vpop.f32.mrb[36].mxu1  ;;  %v975_v33 = vpop.f32.mrb[37].mxu0  ;;  %1915 = vperm.xlu1 %3055, %v3621_v61  }
 0x26b   : > { %v1236_v35 = vadd.f32 %v1184_v1, %v1180_v14  ;;  %v1223_v36 = vadd.f32 %v1183_v26, %v1179_v15  ;;  %v3746_v37 = vadd.f32 %v1086_v32, %v868_v18  ;;  %v3748_v38 = vadd.f32 %v975_v33, %v868_v18  ;;  %v1088_v39 = vpop.f32.mrb[37].mxu1 }
 0x26c   : > { %v1249_v40 = vadd.f32 %v1185_v30, %v1181_v3  ;;  %v1122_v41 = vadd.f32 %v1121_v21, %v3743_v31  ;;  %v1186_v42 = vmul.f32 %v3743_v31, %v3743_v31  ;;  %v3754_v43 = vadd.f32 %v1088_v39, %v868_v18 }
 0x26d   : > { %v1148_v4 = vadd.f32 %v1147_v24, %v3746_v37  ;;  %v1188_v44 = vmul.f32 %v3746_v37, %v3746_v37  ;;  %v1135_v46 = vadd.f32 %v1134_v25, %v3748_v38  ;;  %v1187_v2 = vmul.f32 %v3748_v38, %v3748_v38  ;;  %v979_v47 = vpop.f32.mrb[38].mxu0 }
 0x26e   : > { %v1211_v48 = vadd.f32 %v1210_v28, %v1186_v42  ;;  %v1161_v49 = vadd.f32 %v1160_v29, %v3754_v43  ;;  %v1189_v50 = vmul.f32 %v3754_v43, %v3754_v43  ;;  %v3767_v51 = vadd.f32 %v979_v47, %v873_v45  ;;  %v1092_v52 = vpop.f32.mrb[38].mxu1  ;;  %v981_v53 = vpop.f32.mrb[39].mxu0  ;;  %3056 = vset.pattern.permute.xlu1 %v3256_v34 }
 0x26f   : > { %v1237_v54 = vadd.f32 %v1236_v35, %v1188_v44  ;;  %v1224_v56 = vadd.f32 %v1223_v36, %v1187_v2  ;;  %v3769_v57 = vadd.f32 %v1092_v52, %v873_v45  ;;  %v3771_v60 = vadd.f32 %v981_v53, %v873_v45  ;;  %v1094_v0 = vpop.f32.mrb[39].mxu1  ;;  %1891 = vperm.xlu1 %3056, %v3626_v62  }
 0x270   : > { %v1250_v8 = vadd.f32 %v1249_v40, %v1189_v50  ;;  %v1123_v10 = vadd.f32 %v1122_v41, %v3767_v51  ;;  %v1190_v11 = vmul.f32 %v3767_v51, %v3767_v51  ;;  %v3777_v12 = vadd.f32 %v1094_v0, %v873_v45  ;;  %v883_v40 = vpop.permute.xlu1 %882 }
 0x271   : > { %v1149_v14 = vadd.f32 %v1148_v4, %v3769_v57  ;;  %v1192_v15 = vmul.f32 %v3769_v57, %v3769_v57  ;;  %v1136_v18 = vadd.f32 %v1135_v46, %v3771_v60  ;;  %v1191_v20 = vmul.f32 %v3771_v60, %v3771_v60  ;;  %v985_v3 = vpop.f32.mrb[40].mxu0 }
 0x272   : > { %v1212_v21 = vadd.f32 %v1211_v48, %v1190_v11  ;;  %v1162_v22 = vadd.f32 %v1161_v49, %v3777_v12  ;;  %v1193_v24 = vmul.f32 %v3777_v12, %v3777_v12  ;;  %v3790_v1 = vadd.f32 %v985_v3, %v878_v13  ;;  %v1098_v25 = vpop.f32.mrb[40].mxu1  ;;  %v987_v26 = vpop.f32.mrb[41].mxu0 }
 0x273   : > { %v1238_v27 = vadd.f32 %v1237_v54, %v1192_v15  ;;  %v1225_v28 = vadd.f32 %v1224_v56, %v1191_v20  ;;  %v3792_v29 = vadd.f32 %v1098_v25, %v878_v13  ;;  %v3794_v30 = vadd.f32 %v987_v26, %v878_v13  ;;  %v1100_v32 = vpop.f32.mrb[41].mxu1  ;;  %3058 = vset.pattern.permute.xlu1 %v3257_v7 }
 0x274   : > { %v1251_v33 = vadd.f32 %v1250_v8, %v1193_v24  ;;  %v1124_v35 = vadd.f32 %v1123_v10, %v3790_v1  ;;  %v1194_v36 = vmul.f32 %v3790_v1, %v3790_v1  ;;  %v3799_v39 = vadd.f32 %v1100_v32, %v878_v13  ;;  %v888_v13 = vpop.permute.xlu0 %887  ;;  %1923 = vperm.xlu1 %3058, %v3626_v62  }
 0x275   : > { %v1150_v41 = vadd.f32 %v1149_v14, %v3792_v29  ;;  %v1196_v42 = vmul.f32 %v3792_v29, %v3792_v29  ;;  %v1137_v4 = vadd.f32 %v1136_v18, %v3794_v30  ;;  %v1195_v44 = vmul.f32 %v3794_v30, %v3794_v30  ;;  %v991_v45 = vpop.f32.mrb[42].mxu0 }
 0x276   : > { %v1213_v46 = vadd.f32 %v1212_v21, %v1194_v36  ;;  %v1163_v2 = vadd.f32 %v1162_v22, %v3799_v39  ;;  %v1197_v61 = vmul.f32 %v3799_v39, %v3799_v39  ;;  %v3812_v47 = vadd.f32 %v991_v45, %v883_v40  ;;  %v1104_v48 = vpop.f32.mrb[42].mxu1  ;;  %v993_v49 = vpop.f32.mrb[43].mxu0 }
 0x277   : > { %v1239_v50 = vadd.f32 %v1238_v27, %v1196_v42  ;;  %v1226_v52 = vadd.f32 %v1225_v28, %v1195_v44  ;;  %v3815_v53 = vadd.f32 %v1104_v48, %v883_v40  ;;  %v3817_v54 = vadd.f32 %v993_v49, %v883_v40  ;;  %v1106_v56 = vpop.f32.mrb[43].mxu1  ;;  %v893_v42 = vpop.permute.xlu1 %892 }
 0x278   : > { %v1252_v0 = vadd.f32 %v1251_v33, %v1197_v61  ;;  %v1125_v8 = vadd.f32 %v1124_v35, %v3812_v47  ;;  %v1198_v10 = vmul.f32 %v3812_v47, %v3812_v47  ;;  %v3822_v11 = vadd.f32 %v1106_v56, %v883_v40 }
 0x279   : > { %v1151_v59 = vadd.f32 %v1150_v41, %v3815_v53  ;;  %v1200_v14 = vmul.f32 %v3815_v53, %v3815_v53  ;;  %v1138_v15 = vadd.f32 %v1137_v4, %v3817_v54  ;;  %v1199_v18 = vmul.f32 %v3817_v54, %v3817_v54  ;;  %v997_v20 = vpop.f32.mrb[44].mxu0 }
 0x27a   : > { %v1214_v3 = vadd.f32 %v1213_v46, %v1198_v10  ;;  %v1164_v21 = vadd.f32 %v1163_v2, %v3822_v11  ;;  %v1201_v34 = vmul.f32 %v3822_v11, %v3822_v11  ;;  %v3835_v22 = vadd.f32 %v997_v20, %v888_v13  ;;  %v1110_v24 = vpop.f32.mrb[44].mxu1  ;;  %v999_v25 = vpop.f32.mrb[45].mxu0 }
 0x27b   : > { %v1240_v26 = vadd.f32 %v1239_v50, %v1200_v14  ;;  %v1227_v27 = vadd.f32 %v1226_v52, %v1199_v18  ;;  %v3837_v28 = vadd.f32 %v1110_v24, %v888_v13  ;;  %v3839_v32 = vadd.f32 %v999_v25, %v888_v13  ;;  %v1112_v33 = vpop.f32.mrb[45].mxu1 }
 0x27c   : > { %v1253_v35 = vadd.f32 %v1252_v0, %v1201_v34  ;;  %v1126_v36 = vadd.f32 %v1125_v8, %v3835_v22  ;;  %v1202_v40 = vmul.f32 %v3835_v22, %v3835_v22  ;;  %v3844_v41 = vadd.f32 %v1112_v33, %v888_v13 }
 0x27d   : > { %v1152_v4 = vadd.f32 %v1151_v59, %v3837_v28  ;;  %v1204_v44 = vmul.f32 %v3837_v28, %v3837_v28  ;;  %v1139_v45 = vadd.f32 %v1138_v15, %v3839_v32  ;;  %v1203_v46 = vmul.f32 %v3839_v32, %v3839_v32  ;;  %v1003_v2 = vpop.f32.mrb[46].mxu0 }
 0x27e   : > { %4483 = vst [vmem:[#allocation15_spill] sm:$0xff] %v3844_v41  ;;  %v1215_v61 = vadd.f32 %v1214_v3, %v1202_v40  ;;  %v1165_v48 = vadd.f32 %v1164_v21, %v3844_v41  ;;  %v1205_v49 = vmul.f32 %v3844_v41, %v3844_v41  ;;  %v3856_v50 = vadd.f32 %v1003_v2, %v893_v42  ;;  %v1116_v52 = vpop.f32.mrb[46].mxu1  ;;  %v1005_v56 = vpop.f32.mrb[47].mxu0 }
 0x27f   : > { %v1241_v0 = vadd.f32 %v1240_v26, %v1204_v44  ;;  %v1228_v8 = vadd.f32 %v1227_v27, %v1203_v46  ;;  %v3859_v10 = vadd.f32 %v1116_v52, %v893_v42  ;;  %v3861_v13 = vadd.f32 %v1005_v56, %v893_v42  ;;  %v1118_v59 = vpop.f32.mrb[47].mxu1  ;;  %v3877_v27 = vpop.permute.xlu1 %1355 }
 0x280   : > { %v1254_v7 = vadd.f32 %v1253_v35, %v1205_v49  ;;  %v1127_v14 = vadd.f32 %v1126_v36, %v3856_v50  ;;  %v1206_v15 = vmul.f32 %v3856_v50, %v3856_v50  ;;  %v3866_v18 = vadd.f32 %v1118_v59, %v893_v42  ;;  %4484 = vst [vmem:[#allocation16_spill] sm:$0xff] %v3877_v27 }
 0x281   : > { %v1153_v20 = vadd.f32 %v1152_v4, %v3859_v10  ;;  %v1208_v62 = vmul.f32 %v3859_v10, %v3859_v10  ;;  %v1140_v3 = vadd.f32 %v1139_v45, %v3861_v13  ;;  %v1207_v21 = vmul.f32 %v3861_v13, %v3861_v13 }
 0x282   : > { %v1128_v34 = vrot.slane %v1127_v14, 4  ;;  %v1216_v24 = vadd.f32 %v1215_v61, %v1206_v15  ;;  %v1166_v25 = vadd.f32 %v1165_v48, %v3866_v18  ;;  %v1209_v26 = vmul.f32 %v3866_v18, %v3866_v18 }
 0x283   : > { %v1154_v33 = vrot.slane %v1153_v20, 4  ;;  %v1242_v35 = vadd.f32 %v1241_v0, %v1208_v62  ;;  %v1141_v36 = vrot.slane %v1140_v3, 4  ;;  %v1229_v40 = vadd.f32 %v1228_v8, %v1207_v21 }
 0x284   : > { %v1129_v42 = vadd.f32 %v1128_v34, %v1127_v14  ;;  %v1217_v4 = vrot.slane %v1216_v24, 4  ;;  %v1167_v44 = vrot.slane %v1166_v25, 4  ;;  %v1255_v45 = vadd.f32 %v1254_v7, %v1209_v26  ;;  %v3879_v14 = vpop.permute.xlu1 %1415 }
 0x285   : > { %v1155_v46 = vadd.f32 %v1154_v33, %v1153_v20  ;;  %v1243_v2 = vrot.slane %v1242_v35, 4  ;;  %v1142_v49 = vadd.f32 %v1141_v36, %v1140_v3  ;;  %v1230_v52 = vrot.slane %v1229_v40, 4 }
 0x286   : > { %v1130_v61 = vrot.slane %v1129_v42, 2  ;;  %v1218_v56 = vadd.f32 %v1217_v4, %v1216_v24  ;;  %v1168_v48 = vadd.f32 %v1167_v44, %v1166_v25  ;;  %v1256_v59 = vrot.slane %v1255_v45, 4 }
 0x287   : > { %v1156_v15 = vrot.slane %v1155_v46, 2  ;;  %v1244_v16 = vadd.f32 %v1243_v2, %v1242_v35  ;;  %v1143_v55 = vrot.slane %v1142_v49, 2  ;;  %v1231_v27 = vadd.f32 %v1230_v52, %v1229_v40 }
 0x288   : > { %v1131_v41 = vadd.f32 %v1130_v61, %v1129_v42  ;;  %v1219_v0 = vrot.slane %v1218_v56, 2  ;;  %v1169_v62 = vrot.slane %v1168_v48, 2  ;;  %v1257_v8 = vadd.f32 %v1256_v59, %v1255_v45 }
 0x289   : > { %v1157_v21 = vadd.f32 %v1156_v15, %v1155_v46  ;;  %v1245_v7 = vrot.slane %v1244_v16, 2  ;;  %v1144_v20 = vadd.f32 %v1143_v55, %v1142_v49  ;;  %v1232_v34 = vrot.slane %v1231_v27, 2 }
 0x28a   : > { %v1132_v3 = vrot.slane %v1131_v41, 1  ;;  %v1220_v26 = vadd.f32 %v1219_v0, %v1218_v56  ;;  %v1170_v33 = vadd.f32 %v1169_v62, %v1168_v48  ;;  %v1258_v24 = vrot.slane %v1257_v8, 2  ;;  %v3883_v56 = vpop.permute.xlu1 %1359 }
 0x28b   : > { %v1158_v25 = vrot.slane %v1157_v21, 1  ;;  %v1246_v36 = vadd.f32 %v1245_v7, %v1244_v16  ;;  %v1145_v4 = vrot.slane %v1144_v20, 1  ;;  %v1233_v35 = vadd.f32 %v1232_v34, %v1231_v27 }
 0x28c   : > { %v1133_v44 = vadd.f32 %v1132_v3, %v1131_v41  ;;  %v1221_v40 = vrot.slane %v1220_v26, 1  ;;  %v1171_v42 = vrot.slane %v1170_v33, 1  ;;  %v1259_v2 = vadd.f32 %v1258_v24, %v1257_v8 }
 0x28d   : > { %v1159_v52 = vadd.f32 %v1158_v25, %v1157_v21  ;;  %v1247_v45 = vrot.slane %v1246_v36, 1  ;;  %v1146_v61 = vadd.f32 %v1145_v4, %v1144_v20  ;;  %v1234_v59 = vrot.slane %v1233_v35, 1 }
 0x28e   : > { %v3881_v46 = vmul.f32 0.015625, %v1133_v44  ;;  %v1222_v55 = vadd.f32 %v1221_v40, %v1220_v26  ;;  %v1172_v49 = vadd.f32 %v1171_v42, %v1170_v33  ;;  %v1260_v15 = vrot.slane %v1259_v2, 1 }
 0x28f   : > { %v3885_v48 = vmul.f32 0.015625, %v1159_v52  ;;  %v1248_v16 = vadd.f32 %v1247_v45, %v1246_v36  ;;  %v3887_v0 = vmul.f32 0.015625, %v1146_v61  ;;  %v1235_v41 = vadd.f32 %v1234_v59, %v1233_v35  ;;  %v3911_v61 = vpop.permute.xlu1 %1363 }
 0x290   : > { %v1262_v27 = vmul.f32 0.015625, %v1222_v55  ;;  %v1266_v62 = vmul.f32 %v3881_v46, %v3881_v46  ;;  %v1306_v8 = vsub.f32 %v3856_v50, %v3881_v46  ;;  %v3893_v21 = vmul.f32 0.015625, %v1172_v49 }
 0x291   : > { %v1264_v7 = vmul.f32 0.015625, %v1248_v16  ;;  %v1268_v20 = vmul.f32 %v3885_v48, %v3885_v48  ;;  %v1308_v34 = vsub.f32 %v3859_v10, %v3885_v48  ;;  %v1263_v3 = vmul.f32 0.015625, %v1235_v41 }
 0x292   : > { %v1270_v26 = vsub.f32 %v1262_v27, %v1266_v62  ;;  %v1267_v33 = vmul.f32 %v3887_v0, %v3887_v0  ;;  %v1307_v24 = vsub.f32 %v3861_v13, %v3887_v0  ;;  %v1261_v25 = vadd.f32 %v1260_v15, %v1259_v2 }
 0x293   : > { %v1272_v36 = vsub.f32 %v1264_v7, %v1268_v20  ;;  %v1269_v4 = vmul.f32 %v3893_v21, %v3893_v21  ;;  %v1309_v35 = vsub.f32 %v3866_v18, %v3893_v21  ;;  %v1282_v44 = vsub.f32 %v3711_v63, %v3881_v46 }
 0x294   : > { %v1274_v40 = vmax.f32 %v1270_v26, 0.0  ;;  %v1271_v42 = vsub.f32 %v1263_v3, %v1267_v33  ;;  %v1265_v52 = vmul.f32 0.015625, %v1261_v25  ;;  %v1283_v45 = vsub.f32 %v3721_v19, %v3887_v0  ;;  %v1428_v3 = vpop.permute.xlu1 %1427 }
 0x295   : > { %v1276_v59 = vmax.f32 %v1272_v36, 0.0  ;;  %v1284_v2 = vsub.f32 %v3719_v17, %v3885_v48  ;;  %v1285_v55 = vsub.f32 %v3729_v23, %v3893_v21  ;;  %v1286_v49 = vsub.f32 %v3743_v31, %v3881_v46 }
 0x296   : > { %v1310_v15 = vadd.f32 1e-05, %v1274_v40  ;;  %v1275_v63 = vmax.f32 %v1271_v42, 0.0  ;;  %v1273_v16 = vsub.f32 %v1265_v52, %v1269_v4  ;;  %v1287_v41 = vsub.f32 %v3748_v38, %v3887_v0  ;;  %v4485_v42 = vld [vmem:[#allocation15_spill] sm:$0xff] }
 0x297   : > { %v1312_v27 = vadd.f32 1e-05, %v1276_v59  ;;  %v1288_v19 = vsub.f32 %v3746_v37, %v3885_v48  ;;  %v1289_v62 = vsub.f32 %v3754_v43, %v3893_v21  ;;  %v1290_v17 = vsub.f32 %v3767_v51, %v3881_v46 }
 0x298   : > { %3069 = vrsqrt.f32 %v1310_v15  ;;  %v1311_v23 = vadd.f32 1e-05, %v1275_v63  ;;  %v1277_v7 = vmax.f32 %v1273_v16, 0.0  ;;  %v1291_v31 = vsub.f32 %v3771_v60, %v3887_v0  ;;  %v3939_v60 = vpop.permute.xlu0 %1351  ;;  %v3967_v59 = vpop.permute.xlu1 %1371 }
 0x299   : > { %3071 = vrsqrt.f32 %v1312_v27  ;;  %v1292_v38 = vsub.f32 %v3769_v57, %v3885_v48  ;;  %v1293_v20 = vsub.f32 %v3777_v12, %v3893_v21  ;;  %v1278_v37 = vsub.f32 %v3699_v58, %v3881_v46 }
 0x29a   : > { %3073 = vrsqrt.f32 %v1311_v23  ;;  %v1313_v43 = vadd.f32 1e-05, %v1277_v7  ;;  %v1279_v51 = vsub.f32 %v3705_v6, %v3887_v0  ;;  %v1280_v26 = vsub.f32 %v3703_v5, %v3885_v48 }
 0x29b   : > { %v1281_v57 = vsub.f32 %v3707_v9, %v3893_v21  ;;  %v1298_v12 = vsub.f32 %v3812_v47, %v3881_v46  ;;  %v1299_v58 = vsub.f32 %v3817_v54, %v3887_v0  ;;  %v1300_v33 = vsub.f32 %v3815_v53, %v3885_v48 }
 0x29c   : > { %3075 = vrsqrt.f32 %v1313_v43  ;;  %v1301_v6 = vsub.f32 %v3822_v11, %v3893_v21  ;;  %v1294_v5 = vsub.f32 %v3790_v1, %v3881_v46  ;;  %v3969_v15 = vpop.permute.xlu0 %1367  ;;  %v4487_v53 = vsub.f32 %v3794_v30, %v3887_v0 }
 0x2a2   : > { %v3971_v63 = vpop.eup %3069 }
 0x2a3   : > { %v3973_v16 = vpop.eup %3071  ;;  %v3979_v27 = vmul.f32 %v3971_v63, %v1306_v8  ;;  %v1322_v23 = vmul.f32 %v3971_v63, %v1282_v44  ;;  %v1326_v7 = vmul.f32 %v3971_v63, %v1286_v49  ;;  %v1330_v43 = vmul.f32 %v3971_v63, %v1290_v17  ;;  %v4486_v17 = vld [vmem:[#allocation16_spill] sm:$0xff] }
 0x2a4   : > { %v3984_v52 = vpop.eup %3073  ;;  %v3990_v40 = vmul.f32 %v3973_v16, %v1308_v34  ;;  %v1324_v4 = vmul.f32 %v3973_v16, %v1284_v2  ;;  %v1328_v50 = vmul.f32 %v3973_v16, %v1288_v19  ;;  %v1332_v8 = vmul.f32 %v3973_v16, %v1292_v38 }
 0x2a5   : > { %v3999_v44 = vmul.f32 %v3984_v52, %v1307_v24  ;;  %v1323_v49 = vmul.f32 %v3984_v52, %v1283_v45  ;;  %v1386_v36 = vmul.f32 %v4486_v17, %v1322_v23  ;;  %v1327_v10 = vmul.f32 %v3984_v52, %v1287_v41  ;;  %v1432_v24 = vpop.permute.xlu1 %1431 }
 0x2a6   : > { %v4004_v34 = vpop.eup %3075  ;;  %v1388_v2 = vmul.f32 %v4486_v17, %v1324_v4  ;;  %v4008_v19 = vmul.f32 %v3883_v56, %v1326_v7  ;;  %v4011_v38 = vmul.f32 %v3883_v56, %v1328_v50  ;;  %v1331_v13 = vmul.f32 %v3984_v52, %v1291_v31  ;;  %v1420_v7 = vpop.permute.xlu0 %1419 }
 0x2a7   : > { %v4018_v45 = vmul.f32 %v4004_v34, %v1309_v35  ;;  %v1325_v41 = vmul.f32 %v4004_v34, %v1285_v55  ;;  %v1387_v23 = vmul.f32 %v4486_v17, %v1323_v49  ;;  %v1329_v4 = vmul.f32 %v4004_v34, %v1289_v62 }
 0x2a8   : > { %v4024_v47 = vmul.f32 %v3883_v56, %v1327_v10  ;;  %v1333_v50 = vmul.f32 %v4004_v34, %v1293_v20  ;;  %v1394_v31 = vmul.f32 %v3911_v61, %v1330_v43  ;;  %v1395_v9 = vmul.f32 %v3911_v61, %v1331_v13 }
 0x2a9   : > { %v1389_v18 = vmul.f32 %v4486_v17, %v1325_v41  ;;  %v4031_v35 = vmul.f32 %v3883_v56, %v1329_v4  ;;  %v1396_v55 = vmul.f32 %v3911_v61, %v1332_v8  ;;  %v1318_v49 = vmul.f32 %v3971_v63, %v1278_v37  ;;  %v1376_v8 = vpop.permute.xlu1 %1375 }
 0x2aa   : > { %v1397_v62 = vmul.f32 %v3911_v61, %v1333_v50  ;;  %v4036_v25 = vadd.f32 %v1428_v3, %v1394_v31  ;;  %v4038_v10 = vadd.f32 %v1428_v3, %v1395_v9  ;;  %v1319_v20 = vmul.f32 %v3984_v52, %v1279_v51 }
 0x2ab   : > { %v4041_v43 = vadd.f32 %v1428_v3, %v1396_v55  ;;  %v1320_v13 = vmul.f32 %v3973_v16, %v1280_v26  ;;  %v1321_v17 = vmul.f32 %v4004_v34, %v1281_v57  ;;  %v1382_v56 = vmul.f32 %v3939_v60, %v1318_v49 }
 0x2ac   : > { %v4046_v41 = vadd.f32 %v1428_v3, %v1397_v62  ;;  %v1490_v37 = vmax.f32 %v4036_v25, 0.0  ;;  %v4050_v61 = vmul.f32 %v3939_v60, %v1319_v20  ;;  %v1338_v9 = vmul.f32 %v3971_v63, %v1298_v12  ;;  %v1424_v3 = vpop.permute.xlu0 %1423 }
 0x2ad   : > { %v1492_v51 = vmax.f32 %v4041_v43, 0.0  ;;  %v1384_v4 = vmul.f32 %v3939_v60, %v1320_v13  ;;  %v4056_v26 = vmul.f32 %v3939_v60, %v1321_v17  ;;  %v4059_v57 = vadd.f32 %v3879_v14, %v1382_v56 }
 0x2ae   : > { %v1339_v50 = vmul.f32 %v3984_v52, %v1299_v58  ;;  %v1340_v12 = vmul.f32 %v3973_v16, %v1300_v33  ;;  %v1341_v60 = vmul.f32 %v4004_v34, %v1301_v6  ;;  %v1402_v31 = vmul.f32 %v3967_v59, %v1338_v9 }
 0x2af   : > { %v4075_v55 = vadd.f32 %v3879_v14, %v1384_v4  ;;  %v1478_v49 = vmax.f32 %v4059_v57, 0.0  ;;  %v1334_v54 = vmul.f32 %v3971_v63, %v1294_v5  ;;  %v1335_v58 = vmul.f32 %v3984_v52, %v4487_v53 }
 0x2b0   : > { %v1403_v11 = vmul.f32 %v3967_v59, %v1339_v50  ;;  %v1404_v33 = vmul.f32 %v3967_v59, %v1340_v12  ;;  %v1405_v6 = vmul.f32 %v3967_v59, %v1341_v60  ;;  %v4488_v62 = vsub.f32 %v3792_v29, %v3885_v48  ;;  %v1380_v29 = vpop.permute.xlu1 %1379  ;;  %v1436_v53 = vpop.permute.xlu0 %1435 }
 0x2b1   : > { %v1480_v1 = vmax.f32 %v4075_v55, 0.0  ;;  %v4489_v5 = vsub.f32 %v3799_v39, %v3893_v21  ;;  %v1398_v13 = vmul.f32 %v3969_v15, %v1334_v54  ;;  %v1399_v17 = vmul.f32 %v3969_v15, %v1335_v58 }
 0x2b2   : > { %v1336_v20 = vmul.f32 %v3973_v16, %v4488_v62  ;;  %v1450_v9 = vadd.f32 %v1420_v7, %v1386_v36  ;;  %v4101_v59 = vadd.f32 %v1420_v7, %v1387_v23  ;;  %v1452_v4 = vadd.f32 %v1420_v7, %v1388_v2 }
 0x2b3   : > { %v1337_v30 = vmul.f32 %v4004_v34, %v4489_v5  ;;  %v4104_v12 = vadd.f32 %v1432_v24, %v1398_v13  ;;  %v4106_v60 = vadd.f32 %v1432_v24, %v1399_v17  ;;  %v1453_v39 = vadd.f32 %v1420_v7, %v1389_v18 }
 0x2b4   : > { %v1400_v56 = vmul.f32 %v3969_v15, %v1336_v20  ;;  %v1482_v54 = vmax.f32 %v1450_v9, 0.0  ;;  %v1484_v5 = vmax.f32 %v1452_v4, 0.0  ;;  %v4490_v58 = vsub.f32 %v3835_v22, %v3881_v46 }
 0x2b5   : > { %v1401_v50 = vmul.f32 %v3969_v15, %v1337_v30  ;;  %v1494_v2 = vmax.f32 %v4104_v12, 0.0  ;;  %v4491_v15 = vsub.f32 %v3839_v32, %v3887_v0  ;;  %v4492_v7 = vsub.f32 %v3837_v28, %v3885_v48  ;;  %v1514_v12 = vld [vmem:[%s4450_s3] sm:$0xff] }
 0x2b6   : > { %v4108_v62 = vadd.f32 %v1432_v24, %v1400_v56  ;;  %v1342_v36 = vmul.f32 %v3971_v63, %v4490_v58  ;;  %v4493_v22 = vsub.f32 %v4485_v42, %v3893_v21  ;;  %v1455_v32 = vadd.f32 %v1424_v3, %v4024_v47  ;;  %v1444_v56 = vpop.permute.xlu1 %1443 }
 0x2b7   : > { %v4114_v23 = vadd.f32 %v1432_v24, %v1401_v50  ;;  %v1343_v20 = vmul.f32 %v3984_v52, %v4491_v15  ;;  %v1344_v18 = vmul.f32 %v3973_v16, %v4492_v7  ;;  %v1454_v24 = vadd.f32 %v1424_v3, %v4008_v19  ;;  %v1440_v19 = vpop.permute.xlu0 %1439 }
 0x2b8   : > { %v1496_v30 = vmax.f32 %v4108_v62, 0.0  ;;  %v1345_v46 = vmul.f32 %v4004_v34, %v4493_v22  ;;  %v1406_v63 = vmul.f32 %v1376_v8, %v1342_v36  ;;  %v1456_v0 = vadd.f32 %v1424_v3, %v4011_v38 }
 0x2b9   : > { %v1407_v13 = vmul.f32 %v1376_v8, %v1343_v20  ;;  %v1408_v17 = vmul.f32 %v1376_v8, %v1344_v18  ;;  %v1457_v28 = vadd.f32 %v1424_v3, %v4031_v35  ;;  %v1486_v48 = vmax.f32 %v1454_v24, 0.0 }
 0x2ba   : > { %v1409_v52 = vmul.f32 %v1376_v8, %v1345_v46  ;;  %v1410_v16 = vmul.f32 %v1380_v29, %v3979_v27  ;;  %v1488_v9 = vmax.f32 %v1456_v0, 0.0  ;;  %v1411_v21 = vmul.f32 %v1380_v29, %v3999_v44 }
 0x2bb   : > { %v1412_v42 = vmul.f32 %v1380_v29, %v3990_v40  ;;  %v1413_v34 = vmul.f32 %v1380_v29, %v4018_v45  ;;  %v1466_v4 = vadd.f32 %v1436_v53, %v1402_v31  ;;  %v1467_v50 = vadd.f32 %v1436_v53, %v1403_v11 }
 0x2bc   : > { %v1468_v47 = vadd.f32 %v1436_v53, %v1404_v33  ;;  %v1469_v62 = vadd.f32 %v1436_v53, %v1405_v6  ;;  %v1474_v38 = vadd.f32 %v1444_v56, %v1410_v16  ;;  %v1475_v8 = vadd.f32 %v1444_v56, %v1411_v21  ;;  %v1959_v16 = vld [vmem:[%s4453_s6 + $0x8] sm:$0xff] }
 0x2bd   : > { %v1476_v58 = vadd.f32 %v1444_v56, %v1412_v42  ;;  %v1477_v35 = vadd.f32 %v1444_v56, %v1413_v34  ;;  %v1498_v3 = vmax.f32 %v1466_v4, 0.0  ;;  %v1470_v27 = vadd.f32 %v1440_v19, %v1406_v63  ;;  %v1521_v34 = vpop.permute.xlu0 %1520 }
 0x2be   : > { %v1500_v36 = vmax.f32 %v1468_v47, 0.0  ;;  %v1471_v15 = vadd.f32 %v1440_v19, %v1407_v13  ;;  %v1506_v20 = vmax.f32 %v1474_v38, 0.0  ;;  %v1472_v44 = vadd.f32 %v1440_v19, %v1408_v17 }
 0x2bf   : > { %v1508_v7 = vmax.f32 %v1476_v58, 0.0  ;;  %v1473_v18 = vadd.f32 %v1440_v19, %v1409_v52  ;;  %v1502_v40 = vmax.f32 %v1470_v27, 0.0  ;;  %v1447_v45 = vadd.f32 %v3879_v14, %v4050_v61  ;;  %v1526_v19 = vpop.permute.xlu1 %1525 }
 0x2c0   : > { %v1483_v31 = vmax.f32 %v4101_v59, 0.0  ;;  %v1449_v11 = vadd.f32 %v3879_v14, %v4056_v26  ;;  %v1504_v33 = vmax.f32 %v1472_v44, 0.0  ;;  %v1485_v6 = vmax.f32 %v1453_v39, 0.0 }
 0x2c1   : > { %v2906_v29 = vpack.c.bf16 %v1482_v54, %v1478_v49  ;;  %v2922_v53 = vpack.c.bf16 %v1484_v5, %v1480_v1  ;;  %v1479_v22 = vmax.f32 %v1447_v45, 0.0  ;;  %v1487_v63 = vmax.f32 %v1455_v32, 0.0 }
 0x2c2   : > { %v1481_v46 = vmax.f32 %v1449_v11, 0.0  ;;  %v1491_v24 = vmax.f32 %v4038_v10, 0.0  ;;  %v1489_v13 = vmax.f32 %v1457_v28, 0.0  ;;  %v1493_v61 = vmax.f32 %v4046_v41, 0.0  ;;  %v1516_v28 = vld [vmem:[%s4450_s3 + $0x10] sm:$0xff] }
 0x2c3   : > { %v2910_v59 = vpack.c.bf16 %v1490_v37, %v1486_v48  ;;  %v2926_v14 = vpack.c.bf16 %v1492_v51, %v1488_v9  ;;  %v2904_v26 = vpack.c.bf16 %v1483_v31, %v1479_v22  ;;  %v1495_v55 = vmax.f32 %v4106_v60, 0.0  ;;  %v1517_v48 = vld [vmem:[%s4450_s3 + $0x18] sm:$0xff] }
 0x2c4   : > { %v2920_v57 = vpack.c.bf16 %v1485_v6, %v1481_v46  ;;  %v2908_v49 = vpack.c.bf16 %v1491_v24, %v1487_v63  ;;  %v2924_v1 = vpack.c.bf16 %v1493_v61, %v1489_v13  ;;  %v1499_v39 = vmax.f32 %v1467_v50, 0.0  ;;  %v4495_v9 = vld [vmem:[#allocation14_spill] sm:$0xff] }
 0x2c5   : > { %v1497_v54 = vmax.f32 %v4114_v23, 0.0  ;;  %v1501_v5 = vmax.f32 %v1469_v62, 0.0  ;;  %2905 = vmatprep.subr.bf16.mxu0 %v2904_v26  ;;  %v2914_v10 = vpack.c.bf16 %v1498_v3, %v1494_v2  ;;  %v2930_v25 = vpack.c.bf16 %v1500_v36, %v1496_v30  ;;  %v1515_v30 = vld [vmem:[%s4450_s3 + $0x8] sm:$0xff] }
 0x2c6   : > { %2921 = vmatprep.subr.bf16.mxu1 %v2920_v57  ;;  %v1503_v41 = vmax.f32 %v1471_v15, 0.0  ;;  %v1507_v37 = vmax.f32 %v1475_v8, 0.0  ;;  %2907 = vmatpush1.bf16.msra.mxu0 %v2906_v29  ;;  %v2912_v43 = vpack.c.bf16 %v1499_v39, %v1495_v55  ;;  %v1505_v17 = vmax.f32 %v1473_v18, 0.0 }
 0x2c7   : > { %2923 = vmatpush1.bf16.msra.mxu1 %v2922_v53  ;;  %v2928_v51 = vpack.c.bf16 %v1501_v5, %v1497_v54  ;;  %v1509_v32 = vmax.f32 %v1477_v35, 0.0  ;;  %2909 = vmatprep.subr.bf16.mxu0 %v2908_v49  ;;  %v2918_v0 = vpack.c.bf16 %v1506_v20, %v1502_v40  ;;  %v2934_v23 = vpack.c.bf16 %v1508_v7, %v1504_v33  ;;  %v1531_v33 = vpop.permute.xlu1 %1530 }
 0x2c8   : > { %2925 = vmatprep.subr.bf16.mxu1 %v2924_v1  ;;  %v2916_v60 = vpack.c.bf16 %v1507_v37, %v1503_v41  ;;  %v4494_v2 = vmov 0.0   ;;  %v3258_v56 = vmov 6   ;;  %v3259_v21 = vmov 7   ;;  %v1536_v37 = vpop.permute.xlu0 %1535 }
 0x2c9   : > { %v2932_v52 = vpack.c.bf16 %v1509_v32, %v1505_v17  ;;  %3059 = vset.pattern.permute.xlu1 %v3258_v56  ;;  %3060 = vset.pattern.permute.xlu0 %v3258_v56  ;;  %v3260_v42 = vmov 8  }
 0x2ca   : > { %2911 = vmatpush1.bf16.msra.mxu0 %v2910_v59  ;;  %1964 = vperm.xlu1 %3059, %v4495_v9  }
 0x2cb   : > { %2927 = vmatpush1.bf16.msra.mxu1 %v2926_v14  ;;  %2913 = vmatprep.subr.bf16.mxu0 %v2912_v43 }
 0x2cc   : > { %2929 = vmatprep.subr.bf16.mxu1 %v2928_v51  ;;  %1969 = vperm.xlu0 %3060, %v1959_v16  }
 0x2ce   : > { %2915 = vmatpush1.bf16.msra.mxu0 %v2914_v10  ;;  %3061 = vset.pattern.permute.xlu1 %v3259_v21 }
 0x2cf   : > { %2931 = vmatpush1.bf16.msra.mxu1 %v2930_v25  ;;  %2917 = vmatprep.subr.bf16.mxu0 %v2916_v60 }
 0x2d0   : > { %2933 = vmatprep.subr.bf16.mxu1 %v2932_v52  ;;  %3062 = vset.pattern.permute.xlu0 %v3260_v42 }
 0x2d1   : > { %2243 = vperm.xlu1 %3061, %v4495_v9   ;;  %2259 = vperm.xlu0 %3062, %v4495_v9  }
 0x2d2   : > { %2919 = vmatpush1.bf16.msra.mxu0 %v2918_v0 }
 0x2d3   : > { %2935 = vmatpush1.bf16.msra.mxu1 %v2934_v23 }
 0x2d5   : > { %2795 = vmatmul.mubr.msk.f32.vlgmr.msra.gmra.mrb[48].mxu0 %vm1538_vm4, %v1514_v12  ;;  %2247 = vperm.xlu1 %3061, %v1959_v16  }
 0x2d6   : > { %2799 = vmatmul.mubr.msk.f32.vlgmr.msra.gmra.mrb[48].mxu1 %vm1538_vm4, %v1514_v12  ;;  %1621 = vmatprep.mubr.f32.mxu0 %v4494_v2 }
 0x2d7   : > { %1710 = vmatprep.mubr.f32.mxu1 %v4494_v2 }
 0x2d9   : > { %2796 = vmatmul.mubr.msk.f32.gmra.mrb[50].mxu0 %vm1538_vm4, %v1515_v30  ;;  %3063 = vset.pattern.permute.xlu1 %v3260_v42 }
 0x2da   : > { %2800 = vmatmul.mubr.msk.f32.gmra.mrb[50].mxu1 %vm1538_vm4, %v1515_v30  ;;  %1627 = vmatprep.mubr.f32.mxu0 %v4494_v2 }
 0x2db   : > { %1716 = vmatprep.mubr.f32.mxu1 %v4494_v2  ;;  %2263 = vperm.xlu1 %3063, %v1959_v16  }
 0x2dd   : > { %2797 = vmatmul.mubr.msk.f32.gmra.mrb[52].mxu0 %vm1538_vm4, %v1516_v28 }
 0x2de   : > { %2801 = vmatmul.mubr.msk.f32.gmra.mrb[52].mxu1 %vm1538_vm4, %v1516_v28  ;;  %1633 = vmatprep.mubr.f32.mxu0 %v4494_v2 }
 0x2df   : > { %1722 = vmatprep.mubr.f32.mxu1 %v4494_v2 }
 0x2e1   : > { %2798 = vmatmul.mubr.msk.f32.gmra.mrb[54].mxu0 %vm1538_vm4, %v1517_v48 }
 0x2e2   : > { %2802 = vmatmul.mubr.msk.f32.gmra.mrb[54].mxu1 %vm1538_vm4, %v1517_v48  ;;  %2043 = vmatprep.mubr.f32.mxu0 %v4494_v2 }
 0x2e3   : > { %2120 = vmatprep.mubr.f32.mxu1 %v4494_v2 }
 0x3a8   : > { %v1617_v4 = vpop.f32.mrb[48].mxu0 }
 0x3a9   : > { %v1706_v50 = vpop.f32.mrb[48].mxu1  ;;  %v1619_v47 = vpop.f32.mrb[49].mxu0  ;;  %v4191_v38 = vadd.f32 %v1617_v4, %v1521_v34 }
 0x3aa   : > { %v1708_v62 = vpop.f32.mrb[49].mxu1  ;;  %v4193_v8 = vadd.f32 %v1706_v50, %v1521_v34  ;;  %v4195_v58 = vadd.f32 %v1619_v47, %v1521_v34 }
 0x3ab   : > { %v4197_v35 = vadd.f32 %v1708_v62, %v1521_v34  ;;  %v1770_v20 = vmul.f32 %v4191_v38, %v4191_v38 }
 0x3ac   : > { %v1623_v3 = vpop.f32.mrb[50].mxu0  ;;  %v1772_v7 = vmul.f32 %v4193_v8, %v4193_v8  ;;  %v1771_v45 = vmul.f32 %v4195_v58, %v4195_v58 }
 0x3ad   : > { %v1712_v36 = vpop.f32.mrb[50].mxu1  ;;  %v4199_v27 = vadd.f32 %v1623_v3, %v1526_v19  ;;  %v1625_v44 = vpop.f32.mrb[51].mxu0  ;;  %v1773_v11 = vmul.f32 %v4197_v35, %v4197_v35 }
 0x3ae   : > { %v4201_v15 = vadd.f32 %v1712_v36, %v1526_v19  ;;  %v1714_v18 = vpop.f32.mrb[51].mxu1  ;;  %v4207_v40 = vadd.f32 %v1625_v44, %v1526_v19 }
 0x3af   : > { %v4211_v31 = vadd.f32 %v1714_v18, %v1526_v19  ;;  %v1774_v6 = vmul.f32 %v4199_v27, %v4199_v27  ;;  %v1729_v53 = vadd.f32 %v4199_v27, %v4191_v38 }
 0x3b0   : > { %v1776_v29 = vmul.f32 %v4201_v15, %v4201_v15  ;;  %v1747_v22 = vadd.f32 %v4201_v15, %v4193_v8  ;;  %v1738_v46 = vadd.f32 %v4207_v40, %v4195_v58  ;;  %v1775_v63 = vmul.f32 %v4207_v40, %v4207_v40  ;;  %v1629_v61 = vpop.f32.mrb[52].mxu0 }
 0x3b1   : > { %v1756_v24 = vadd.f32 %v4211_v31, %v4197_v35  ;;  %v1777_v13 = vmul.f32 %v4211_v31, %v4211_v31  ;;  %v1718_v59 = vpop.f32.mrb[52].mxu1  ;;  %v4231_v14 = vadd.f32 %v1629_v61, %v1531_v33  ;;  %v1631_v57 = vpop.f32.mrb[53].mxu0  ;;  %v1786_v55 = vadd.f32 %v1774_v6, %v1770_v20 }
 0x3b2   : > { %v4233_v26 = vadd.f32 %v1718_v59, %v1531_v33  ;;  %v1720_v49 = vpop.f32.mrb[53].mxu1  ;;  %v1804_v1 = vadd.f32 %v1776_v29, %v1772_v7  ;;  %v1795_v39 = vadd.f32 %v1775_v63, %v1771_v45  ;;  %v4235_v5 = vadd.f32 %v1631_v57, %v1531_v33 }
 0x3b3   : > { %v1813_v54 = vadd.f32 %v1777_v13, %v1773_v11  ;;  %v4237_v10 = vadd.f32 %v1720_v49, %v1531_v33  ;;  %v1778_v25 = vmul.f32 %v4231_v14, %v4231_v14  ;;  %v1730_v43 = vadd.f32 %v1729_v53, %v4231_v14 }
 0x3b4   : > { %v1780_v41 = vmul.f32 %v4233_v26, %v4233_v26  ;;  %v1748_v51 = vadd.f32 %v1747_v22, %v4233_v26  ;;  %v1739_v17 = vadd.f32 %v1738_v46, %v4235_v5  ;;  %v1779_v32 = vmul.f32 %v4235_v5, %v4235_v5  ;;  %v1635_v23 = vpop.f32.mrb[54].mxu0 }
 0x3b5   : > { %v1757_v60 = vadd.f32 %v1756_v24, %v4237_v10  ;;  %v1781_v0 = vmul.f32 %v4237_v10, %v4237_v10  ;;  %v1724_v52 = vpop.f32.mrb[54].mxu1  ;;  %v4251_v12 = vadd.f32 %v1635_v23, %v1536_v37  ;;  %v1787_v30 = vadd.f32 %v1786_v55, %v1778_v25  ;;  %v1637_v16 = vpop.f32.mrb[55].mxu0 }
 0x3b6   : > { %v4253_v28 = vadd.f32 %v1724_v52, %v1536_v37  ;;  %v1805_v48 = vadd.f32 %v1804_v1, %v1780_v41  ;;  %v1726_v56 = vpop.f32.mrb[55].mxu1  ;;  %v1796_v9 = vadd.f32 %v1795_v39, %v1779_v32  ;;  %v4255_v42 = vadd.f32 %v1637_v16, %v1536_v37 }
 0x3b7   : > { %v1814_v21 = vadd.f32 %v1813_v54, %v1781_v0  ;;  %v4257_v34 = vadd.f32 %v1726_v56, %v1536_v37  ;;  %v1731_v19 = vadd.f32 %v1730_v43, %v4251_v12  ;;  %v1782_v4 = vmul.f32 %v4251_v12, %v4251_v12 }
 0x3b8   : > { %v1749_v50 = vadd.f32 %v1748_v51, %v4253_v28  ;;  %v1784_v47 = vmul.f32 %v4253_v28, %v4253_v28  ;;  %v1740_v62 = vadd.f32 %v1739_v17, %v4255_v42  ;;  %v1783_v3 = vmul.f32 %v4255_v42, %v4255_v42 }
 0x3b9   : > { %v1758_v36 = vadd.f32 %v1757_v60, %v4257_v34  ;;  %v1785_v20 = vmul.f32 %v4257_v34, %v4257_v34  ;;  %v1732_v7 = vrot.slane %v1731_v19, 4  ;;  %v1788_v44 = vadd.f32 %v1787_v30, %v1782_v4 }
 0x3ba   : > { %v1750_v18 = vrot.slane %v1749_v50, 4  ;;  %v1806_v45 = vadd.f32 %v1805_v48, %v1784_v47  ;;  %v1741_v11 = vrot.slane %v1740_v62, 4  ;;  %v1797_v33 = vadd.f32 %v1796_v9, %v1783_v3 }
 0x3bb   : > { %v1759_v6 = vrot.slane %v1758_v36, 4  ;;  %v1815_v29 = vadd.f32 %v1814_v21, %v1785_v20  ;;  %v1733_v53 = vadd.f32 %v1732_v7, %v1731_v19  ;;  %v1789_v22 = vrot.slane %v1788_v44, 4 }
 0x3bc   : > { %v1751_v46 = vadd.f32 %v1750_v18, %v1749_v50  ;;  %v1807_v63 = vrot.slane %v1806_v45, 4  ;;  %v1742_v24 = vadd.f32 %v1741_v11, %v1740_v62  ;;  %v1798_v13 = vrot.slane %v1797_v33, 4 }
 0x3bd   : > { %v1760_v61 = vadd.f32 %v1759_v6, %v1758_v36  ;;  %v1816_v59 = vrot.slane %v1815_v29, 4  ;;  %v1734_v57 = vrot.slane %v1733_v53, 2  ;;  %v1790_v49 = vadd.f32 %v1789_v22, %v1788_v44 }
 0x3be   : > { %v1752_v55 = vrot.slane %v1751_v46, 2  ;;  %v1808_v1 = vadd.f32 %v1807_v63, %v1806_v45  ;;  %v1743_v39 = vrot.slane %v1742_v24, 2  ;;  %v1799_v54 = vadd.f32 %v1798_v13, %v1797_v33 }
 0x3bf   : > { %v1761_v25 = vrot.slane %v1760_v61, 2  ;;  %v1817_v41 = vadd.f32 %v1816_v59, %v1815_v29  ;;  %v1735_v37 = vadd.f32 %v1734_v57, %v1733_v53  ;;  %v1791_v43 = vrot.slane %v1790_v49, 2 }
 0x3c0   : > { %v1753_v51 = vadd.f32 %v1752_v55, %v1751_v46  ;;  %v1809_v17 = vrot.slane %v1808_v1, 2  ;;  %v1744_v32 = vadd.f32 %v1743_v39, %v1742_v24  ;;  %v1800_v60 = vrot.slane %v1799_v54, 2 }
 0x3c1   : > { %v1762_v0 = vadd.f32 %v1761_v25, %v1760_v61  ;;  %v1818_v23 = vrot.slane %v1817_v41, 2  ;;  %v1736_v52 = vrot.slane %v1735_v37, 1  ;;  %v1792_v30 = vadd.f32 %v1791_v43, %v1790_v49 }
 0x3c2   : > { %v1754_v48 = vrot.slane %v1753_v51, 1  ;;  %v1810_v16 = vadd.f32 %v1809_v17, %v1808_v1  ;;  %v1745_v56 = vrot.slane %v1744_v32, 1  ;;  %v1801_v9 = vadd.f32 %v1800_v60, %v1799_v54  ;;  %v1880_v54 = vpop.permute.xlu1 %1879 }
 0x3c3   : > { %v1763_v21 = vrot.slane %v1762_v0, 1  ;;  %v1819_v19 = vadd.f32 %v1818_v23, %v1817_v41  ;;  %v1737_v4 = vadd.f32 %v1736_v52, %v1735_v37  ;;  %v1793_v50 = vrot.slane %v1792_v30, 1 }
 0x3c4   : > { %v1755_v47 = vadd.f32 %v1754_v48, %v1753_v51  ;;  %v1811_v62 = vrot.slane %v1810_v16, 1  ;;  %v1746_v3 = vadd.f32 %v1745_v56, %v1744_v32  ;;  %v1802_v36 = vrot.slane %v1801_v9, 1 }
 0x3c5   : > { %v1764_v20 = vadd.f32 %v1763_v21, %v1762_v0  ;;  %v1820_v7 = vrot.slane %v1819_v19, 1  ;;  %v1766_v44 = vmul.f32 0.03125, %v1737_v4  ;;  %v1794_v18 = vadd.f32 %v1793_v50, %v1792_v30 }
 0x3c6   : > { %v1768_v45 = vmul.f32 0.03125, %v1755_v47  ;;  %v1812_v11 = vadd.f32 %v1811_v62, %v1810_v16  ;;  %v4271_v33 = vmul.f32 0.03125, %v1746_v3  ;;  %v1803_v6 = vadd.f32 %v1802_v36, %v1801_v9  ;;  %v1912_v56 = vpop.permute.xlu1 %1911  ;;  %v1884_v9 = vpop.permute.xlu0 %1883 }
 0x3c7   : > { %v4273_v29 = vmul.f32 0.03125, %v1764_v20  ;;  %v1821_v53 = vadd.f32 %v1820_v7, %v1819_v19  ;;  %v1822_v22 = vmul.f32 0.03125, %v1794_v18  ;;  %v1826_v46 = vmul.f32 %v1766_v44, %v1766_v44 }
 0x3c8   : > { %v1850_v63 = vsub.f32 %v4251_v12, %v1766_v44  ;;  %v1824_v24 = vmul.f32 0.03125, %v1812_v11  ;;  %v1828_v13 = vmul.f32 %v1768_v45, %v1768_v45  ;;  %v1852_v61 = vsub.f32 %v4253_v28, %v1768_v45 }
 0x3c9   : > { %v1823_v59 = vmul.f32 0.03125, %v1803_v6  ;;  %v1827_v57 = vmul.f32 %v4271_v33, %v4271_v33  ;;  %v1830_v49 = vsub.f32 %v1822_v22, %v1826_v46  ;;  %v1851_v55 = vsub.f32 %v4255_v42, %v4271_v33 }
 0x3ca   : > { %v1825_v1 = vmul.f32 0.03125, %v1821_v53  ;;  %v1829_v39 = vmul.f32 %v4273_v29, %v4273_v29  ;;  %v1832_v25 = vsub.f32 %v1824_v24, %v1828_v13  ;;  %v1853_v12 = vsub.f32 %v4257_v34, %v4273_v29 }
 0x3cb   : > { %v1831_v41 = vsub.f32 %v1823_v59, %v1827_v57  ;;  %v1838_v28 = vsub.f32 %v4191_v38, %v1766_v44  ;;  %v1834_v37 = vmax.f32 %v1830_v49, 0.0  ;;  %v1839_v51 = vsub.f32 %v4195_v58, %v4271_v33 }
 0x3cc   : > { %v1833_v43 = vsub.f32 %v1825_v1, %v1829_v39  ;;  %v1840_v17 = vsub.f32 %v4193_v8, %v1768_v45  ;;  %v1836_v42 = vmax.f32 %v1832_v25, 0.0  ;;  %v1841_v60 = vsub.f32 %v4197_v35, %v4273_v29 }
 0x3cd   : > { %v1835_v32 = vmax.f32 %v1831_v41, 0.0  ;;  %v1842_v0 = vsub.f32 %v4199_v27, %v1766_v44  ;;  %v1854_v23 = vadd.f32 1e-05, %v1834_v37  ;;  %v1843_v34 = vsub.f32 %v4207_v40, %v4271_v33 }
 0x3ce   : > { %v1837_v52 = vmax.f32 %v1833_v43, 0.0  ;;  %v1844_v38 = vsub.f32 %v4201_v15, %v1768_v45  ;;  %v1856_v30 = vadd.f32 1e-05, %v1836_v42  ;;  %v1845_v58 = vsub.f32 %v4211_v31, %v4273_v29  ;;  %v4303_v15 = vpop.permute.xlu1 %1915 }
 0x3cf   : > { %v1855_v48 = vadd.f32 1e-05, %v1835_v32  ;;  %v1846_v8 = vsub.f32 %v4231_v14, %v1766_v44  ;;  %3077 = vrsqrt.f32 %v1854_v23  ;;  %v1847_v35 = vsub.f32 %v4235_v5, %v4271_v33 }
 0x3d0   : > { %v1857_v16 = vadd.f32 1e-05, %v1837_v52  ;;  %v1848_v27 = vsub.f32 %v4233_v26, %v1768_v45  ;;  %3079 = vrsqrt.f32 %v1856_v30  ;;  %v1849_v40 = vsub.f32 %v4237_v10, %v4273_v29  ;;  %v1888_v45 = vpop.permute.xlu0 %1887 }
 0x3d1   : > { %3081 = vrsqrt.f32 %v1855_v48 }
 0x3d2   : > { %3083 = vrsqrt.f32 %v1857_v16  ;;  %v1892_v26 = vpop.permute.xlu1 %1891 }
 0x3d4   : > { %v1920_v42 = vpop.permute.xlu0 %1919 }
 0x3d9   : > { %v3078_v31 = vpop.eup %3077 }
 0x3da   : > { %v3080_v21 = vpop.eup %3079  ;;  %v1874_v14 = vmul.f32 %v3078_v31, %v1850_v63  ;;  %v1862_v19 = vmul.f32 %v3078_v31, %v1838_v28  ;;  %v1866_v4 = vmul.f32 %v3078_v31, %v1842_v0  ;;  %v1870_v50 = vmul.f32 %v3078_v31, %v1846_v8  ;;  %v1924_v28 = vpop.permute.xlu1 %1923 }
 0x3db   : > { %v3082_v47 = vpop.eup %3081  ;;  %v1876_v62 = vmul.f32 %v3080_v21, %v1852_v61  ;;  %v1864_v5 = vmul.f32 %v3080_v21, %v1840_v17  ;;  %v1868_v3 = vmul.f32 %v3080_v21, %v1844_v38  ;;  %v1872_v36 = vmul.f32 %v3080_v21, %v1848_v27 }
 0x3dc   : > { %v3084_v20 = vpop.eup %3083  ;;  %v1875_v7 = vmul.f32 %v3082_v47, %v1851_v55  ;;  %v1863_v10 = vmul.f32 %v3082_v47, %v1839_v51  ;;  %v1894_v44 = vmul.f32 %v1880_v54, %v1862_v19  ;;  %v1867_v18 = vmul.f32 %v3082_v47, %v1843_v34 }
 0x3dd   : > { %v1877_v11 = vmul.f32 %v3084_v20, %v1853_v12  ;;  %v1865_v33 = vmul.f32 %v3084_v20, %v1841_v60  ;;  %v1896_v6 = vmul.f32 %v1880_v54, %v1864_v5  ;;  %v1869_v29 = vmul.f32 %v3084_v20, %v1845_v58 }
 0x3de   : > { %v1895_v53 = vmul.f32 %v1880_v54, %v1863_v10  ;;  %v1926_v22 = vadd.f32 %v1912_v56, %v1894_v44  ;;  %v1898_v46 = vmul.f32 %v1884_v9, %v1866_v4  ;;  %v1899_v63 = vmul.f32 %v1884_v9, %v1867_v18 }
 0x3df   : > { %v1897_v24 = vmul.f32 %v1880_v54, %v1865_v33  ;;  %v1928_v13 = vadd.f32 %v1912_v56, %v1896_v6  ;;  %v1900_v61 = vmul.f32 %v1884_v9, %v1868_v3  ;;  %v1901_v59 = vmul.f32 %v1884_v9, %v1869_v29  ;;  %v3117_v29 = vld [vmem:[%s4453_s6] sm:$0xff] }
 0x3e0   : > { %v1927_v57 = vadd.f32 %v1912_v56, %v1895_v53  ;;  %v1942_v49 = vmax.f32 %v1926_v22, 0.0  ;;  %v1930_v55 = vadd.f32 %v4303_v15, %v1898_v46  ;;  %v1906_v1 = vmul.f32 %v1892_v26, %v1874_v14  ;;  %v2544_v53 = vld [vmem:[%s4453_s6] sm:$0x1] }
 0x3e1   : > { %v1929_v39 = vadd.f32 %v1912_v56, %v1897_v24  ;;  %v1944_v25 = vmax.f32 %v1928_v13, 0.0  ;;  %v1932_v41 = vadd.f32 %v4303_v15, %v1900_v61  ;;  %v1907_v12 = vmul.f32 %v1892_v26, %v1875_v7 }
 0x3e2   : > { %v1946_v37 = vmax.f32 %v1930_v55, 0.0  ;;  %v1908_v43 = vmul.f32 %v1892_v26, %v1876_v62  ;;  %v1909_v51 = vmul.f32 %v1892_v26, %v1877_v11  ;;  %v1871_v17 = vmul.f32 %v3082_v47, %v1847_v35  ;;  %v1961_v11 = vld [vmem:[#allocation6 + $0x8] sm:$0xff] }
 0x3e3   : > { %v1948_v54 = vmax.f32 %v1932_v41, 0.0  ;;  %v1873_v32 = vmul.f32 %v3084_v20, %v1849_v40  ;;  %v1902_v60 = vmul.f32 %v1888_v45, %v1870_v50  ;;  %v1904_v0 = vmul.f32 %v1888_v45, %v1872_v36 }
 0x3e4   : > { %v1903_v23 = vmul.f32 %v1888_v45, %v1871_v17  ;;  %v1938_v52 = vadd.f32 %v1924_v28, %v1906_v1  ;;  %v1939_v34 = vadd.f32 %v1924_v28, %v1907_v12  ;;  %v1940_v38 = vadd.f32 %v1924_v28, %v1908_v43 }
 0x3e5   : > { %v1905_v30 = vmul.f32 %v1888_v45, %v1873_v32  ;;  %v1941_v48 = vadd.f32 %v1924_v28, %v1909_v51  ;;  %v1934_v58 = vadd.f32 %v1920_v42, %v1902_v60  ;;  %v1936_v8 = vadd.f32 %v1920_v42, %v1904_v0 }
 0x3e6   : > { %v1954_v16 = vmax.f32 %v1938_v52, 0.0  ;;  %v1956_v56 = vmax.f32 %v1940_v38, 0.0  ;;  %v1935_v27 = vadd.f32 %v1920_v42, %v1903_v23  ;;  %v1931_v9 = vadd.f32 %v4303_v15, %v1899_v63  ;;  %v1965_v63 = vpop.permute.xlu1 %1964 }
 0x3e7   : > { %v1937_v31 = vadd.f32 %v1920_v42, %v1905_v30  ;;  %v1950_v35 = vmax.f32 %v1934_v58, 0.0  ;;  %v1952_v21 = vmax.f32 %v1936_v8, 0.0  ;;  %v1943_v14 = vmax.f32 %v1927_v57, 0.0 }
 0x3e8   : > { %v1947_v40 = vmax.f32 %v1931_v9, 0.0  ;;  %v1933_v19 = vadd.f32 %v4303_v15, %v1901_v59  ;;  %v1945_v4 = vmax.f32 %v1929_v39, 0.0  ;;  %v2938_v50 = vpack.c.bf16 %v1946_v37, %v1942_v49  ;;  %v1960_v15 = vld [vmem:[#allocation6] sm:$0xff]  ;;  %v1970_v49 = vpop.permute.xlu0 %1969 }
 0x3e9   : > { %v2946_v47 = vpack.c.bf16 %v1948_v54, %v1944_v25  ;;  %v1951_v62 = vmax.f32 %v1935_v27, 0.0  ;;  %v1955_v5 = vmax.f32 %v1939_v34, 0.0  ;;  %v1953_v3 = vmax.f32 %v1937_v31, 0.0 }
 0x3ea   : > { %v2936_v26 = vpack.c.bf16 %v1947_v40, %v1943_v14  ;;  %v1949_v36 = vmax.f32 %v1933_v19, 0.0  ;;  %v1957_v20 = vmax.f32 %v1941_v48, 0.0  ;;  %v2942_v7 = vpack.c.bf16 %v1954_v16, %v1950_v35 }
 0x3eb   : > { %v2940_v10 = vpack.c.bf16 %v1955_v5, %v1951_v62  ;;  %v2950_v44 = vpack.c.bf16 %v1956_v56, %v1952_v21  ;;  %v3261_v33 = vmov 9   ;;  %v3262_v6 = vmov 10  }
 0x3ec   : > { %2937 = vmatprep.subr.bf16.mxu0 %v2936_v26  ;;  %v2944_v18 = vpack.c.bf16 %v1949_v36, %v1945_v4  ;;  %v2948_v45 = vpack.c.bf16 %v1957_v20, %v1953_v3  ;;  %3064 = vset.pattern.permute.xlu1 %v3261_v33  ;;  %v3263_v22 = vmov 11   ;;  %v3264_v46 = vmov 13  }
 0x3ed   : > { %2939 = vmatpush1.bf16.msra.mxu0 %v2938_v50  ;;  %3065 = vset.pattern.permute.xlu0 %v3262_v6 }
 0x3ee   : > { %2945 = vmatprep.subr.bf16.mxu1 %v2944_v18  ;;  %2941 = vmatprep.subr.bf16.mxu0 %v2940_v10 }
 0x3ef   : > { %2947 = vmatpush1.bf16.msra.mxu1 %v2946_v47  ;;  %2286 = vperm.xlu1 %3064, %v3117_v29  }
 0x3f0   : > { %2949 = vmatprep.subr.bf16.mxu1 %v2948_v45  ;;  %2525 = vperm.xlu0 %3065, %v3117_v29  }
 0x3f1   : > { %2943 = vmatpush1.bf16.msra.mxu0 %v2942_v7 }
 0x3f3   : > { %2951 = vmatpush1.bf16.msra.mxu1 %v2950_v44  ;;  %3066 = vset.pattern.permute.xlu1 %v3263_v22 }
 0x3f4   : > { %2803 = vmatmul.mubr.msk.f32.vlgmr.msra.gmra.mrb[56].mxu0 %vm1972_vm5, %v1960_v15  ;;  %3068 = vset.pattern.permute.xlu0 %v3264_v46 }
 0x3f5   : > { %2049 = vmatprep.mubr.f32.mxu0 %v4494_v2  ;;  %2533 = vperm.xlu1 %3066, %v3117_v29  }
 0x3f6   : > { %2805 = vmatmul.mubr.msk.f32.vlgmr.msra.gmra.mrb[56].mxu1 %vm1972_vm5, %v1960_v15  ;;  %2579 = vperm.xlu0 %3068, %v2544_v53  }
 0x3f7   : > { %2126 = vmatprep.mubr.f32.mxu1 %v4494_v2 }
 0x3f8   : > { %2804 = vmatmul.mubr.msk.f32.gmra.mrb[58].mxu0 %vm1972_vm5, %v1961_v11 }
 0x3f9   : > { %2357 = vmatprep.mubr.f32.mxu0 %v4494_v2 }
 0x3fa   : > { %2806 = vmatmul.mubr.msk.f32.gmra.mrb[58].mxu1 %vm1972_vm5, %v1961_v11 }
 0x3fb   : > { %2428 = vmatprep.mubr.f32.mxu1 %v4494_v2  ;;  %v3265_v2 = vmov 12  }
 0x3fc   : > { %3067 = vset.pattern.permute.xlu1 %v3265_v2 }
 0x3fd   : > { %2546 = vperm.xlu1 %3067, %v3117_v29  }
 0x4c7   : > { %v2045_v24 = vpop.f32.mrb[56].mxu0 }
 0x4c8   : > { %v2047_v13 = vpop.f32.mrb[57].mxu0  ;;  %v4319_v59 = vadd.f32 %v2045_v24, %v1965_v63 }
 0x4c9   : > { %v2122_v61 = vpop.f32.mrb[56].mxu1  ;;  %v4321_v57 = vadd.f32 %v2047_v13, %v1965_v63 }
 0x4ca   : > { %v2124_v55 = vpop.f32.mrb[57].mxu1  ;;  %v4323_v1 = vadd.f32 %v2122_v61, %v1965_v63  ;;  %v2166_v28 = vmul.f32 %v4319_v59, %v4319_v59 }
 0x4cb   : > { %v4325_v39 = vadd.f32 %v2124_v55, %v1965_v63  ;;  %v2051_v25 = vpop.f32.mrb[58].mxu0  ;;  %v2167_v51 = vmul.f32 %v4321_v57, %v4321_v57 }
 0x4cc   : > { %v4327_v41 = vadd.f32 %v2051_v25, %v1970_v49  ;;  %v2053_v12 = vpop.f32.mrb[59].mxu0  ;;  %v2168_v32 = vmul.f32 %v4323_v1, %v4323_v1 }
 0x4cd   : > { %v2128_v37 = vpop.f32.mrb[58].mxu1  ;;  %v4331_v43 = vadd.f32 %v2053_v12, %v1970_v49  ;;  %v2169_v34 = vmul.f32 %v4325_v39, %v4325_v39 }
 0x4ce   : > { %v2133_v17 = vadd.f32 %v4327_v41, %v4319_v59  ;;  %v2170_v42 = vmul.f32 %v4327_v41, %v4327_v41  ;;  %v4339_v54 = vadd.f32 %v2128_v37, %v1970_v49  ;;  %v2130_v60 = vpop.f32.mrb[59].mxu1 }
 0x4cf   : > { %v2140_v0 = vadd.f32 %v4331_v43, %v4321_v57  ;;  %v2171_v23 = vmul.f32 %v4331_v43, %v4331_v43  ;;  %v4347_v52 = vadd.f32 %v2130_v60, %v1970_v49 }
 0x4d0   : > { %v2134_v38 = vrot.slane %v2133_v17, 4  ;;  %v2174_v30 = vadd.f32 %v2170_v42, %v2166_v28  ;;  %v2147_v48 = vadd.f32 %v4339_v54, %v4323_v1  ;;  %v2172_v58 = vmul.f32 %v4339_v54, %v4339_v54 }
 0x4d1   : > { %v2141_v8 = vrot.slane %v2140_v0, 4  ;;  %v2181_v16 = vadd.f32 %v2171_v23, %v2167_v51  ;;  %v2154_v56 = vadd.f32 %v4347_v52, %v4325_v39  ;;  %v2173_v27 = vmul.f32 %v4347_v52, %v4347_v52 }
 0x4d2   : > { %v2135_v9 = vadd.f32 %v2134_v38, %v2133_v17  ;;  %v2175_v31 = vrot.slane %v2174_v30, 4  ;;  %v2148_v35 = vrot.slane %v2147_v48, 4  ;;  %v2188_v21 = vadd.f32 %v2172_v58, %v2168_v32 }
 0x4d3   : > { %v2142_v14 = vadd.f32 %v2141_v8, %v2140_v0  ;;  %v2182_v40 = vrot.slane %v2181_v16, 4  ;;  %v2155_v19 = vrot.slane %v2154_v56, 4  ;;  %v2195_v4 = vadd.f32 %v2173_v27, %v2169_v34 }
 0x4d4   : > { %v2136_v50 = vrot.slane %v2135_v9, 2  ;;  %v2176_v47 = vadd.f32 %v2175_v31, %v2174_v30  ;;  %v2149_v62 = vadd.f32 %v2148_v35, %v2147_v48  ;;  %v2189_v5 = vrot.slane %v2188_v21, 4 }
 0x4d5   : > { %v2143_v3 = vrot.slane %v2142_v14, 2  ;;  %v2183_v26 = vadd.f32 %v2182_v40, %v2181_v16  ;;  %v2156_v36 = vadd.f32 %v2155_v19, %v2154_v56  ;;  %v2196_v20 = vrot.slane %v2195_v4, 4 }
 0x4d6   : > { %v2137_v7 = vadd.f32 %v2136_v50, %v2135_v9  ;;  %v2177_v10 = vrot.slane %v2176_v47, 2  ;;  %v2150_v44 = vrot.slane %v2149_v62, 2  ;;  %v2190_v18 = vadd.f32 %v2189_v5, %v2188_v21 }
 0x4d7   : > { %v2144_v45 = vadd.f32 %v2143_v3, %v2142_v14  ;;  %v2184_v15 = vrot.slane %v2183_v26, 2  ;;  %v2157_v11 = vrot.slane %v2156_v36, 2  ;;  %v2197_v33 = vadd.f32 %v2196_v20, %v2195_v4 }
 0x4d8   : > { %v2138_v6 = vrot.slane %v2137_v7, 1  ;;  %v2178_v29 = vadd.f32 %v2177_v10, %v2176_v47  ;;  %v2151_v53 = vadd.f32 %v2150_v44, %v2149_v62  ;;  %v2191_v22 = vrot.slane %v2190_v18, 2 }
 0x4d9   : > { %v2145_v46 = vrot.slane %v2144_v45, 1  ;;  %v2185_v2 = vadd.f32 %v2184_v15, %v2183_v26  ;;  %v2158_v63 = vadd.f32 %v2157_v11, %v2156_v36  ;;  %v2198_v24 = vrot.slane %v2197_v33, 2 }
 0x4da   : > { %v2139_v13 = vadd.f32 %v2138_v6, %v2137_v7  ;;  %v2179_v61 = vrot.slane %v2178_v29, 1  ;;  %v2152_v49 = vrot.slane %v2151_v53, 1  ;;  %v2192_v55 = vadd.f32 %v2191_v22, %v2190_v18  ;;  %v2244_v18 = vpop.permute.xlu1 %2243 }
 0x4db   : > { %v2146_v25 = vadd.f32 %v2145_v46, %v2144_v45  ;;  %v2186_v12 = vrot.slane %v2185_v2, 1  ;;  %v2159_v28 = vrot.slane %v2158_v63, 1  ;;  %v2199_v37 = vadd.f32 %v2198_v24, %v2197_v33 }
 0x4dc   : > { %v2162_v51 = vmul.f32 0.0625, %v2139_v13  ;;  %v2180_v17 = vadd.f32 %v2179_v61, %v2178_v29  ;;  %v2153_v42 = vadd.f32 %v2152_v49, %v2151_v53  ;;  %v2193_v32 = vrot.slane %v2192_v55, 1 }
 0x4dd   : > { %v2163_v60 = vmul.f32 0.0625, %v2146_v25  ;;  %v2187_v0 = vadd.f32 %v2186_v12, %v2185_v2  ;;  %v2160_v23 = vadd.f32 %v2159_v28, %v2158_v63  ;;  %v2200_v34 = vrot.slane %v2199_v37, 1 }
 0x4de   : > { %v2202_v38 = vmul.f32 0.0625, %v2180_v17  ;;  %v2206_v30 = vmul.f32 %v2162_v51, %v2162_v51  ;;  %v2222_v48 = vsub.f32 %v4327_v41, %v2162_v51  ;;  %v2164_v58 = vmul.f32 0.0625, %v2153_v42 }
 0x4df   : > { %v2194_v8 = vadd.f32 %v2193_v32, %v2192_v55  ;;  %v2203_v16 = vmul.f32 0.0625, %v2187_v0  ;;  %v2207_v56 = vmul.f32 %v2163_v60, %v2163_v60  ;;  %v2223_v27 = vsub.f32 %v4331_v43, %v2163_v60 }
 0x4e0   : > { %v2210_v9 = vsub.f32 %v2202_v38, %v2206_v30  ;;  %v2208_v31 = vmul.f32 %v2164_v58, %v2164_v58  ;;  %v2224_v35 = vsub.f32 %v4339_v54, %v2164_v58  ;;  %v2165_v21 = vmul.f32 0.0625, %v2160_v23 }
 0x4e1   : > { %v2204_v14 = vmul.f32 0.0625, %v2194_v8  ;;  %v2211_v40 = vsub.f32 %v2203_v16, %v2207_v56  ;;  %v2201_v19 = vadd.f32 %v2200_v34, %v2199_v37  ;;  %v2218_v4 = vsub.f32 %v4319_v59, %v2162_v51 }
 0x4e2   : > { %v2214_v50 = vmax.f32 %v2210_v9, 0.0  ;;  %v2209_v47 = vmul.f32 %v2165_v21, %v2165_v21  ;;  %v2225_v41 = vsub.f32 %v4347_v52, %v2165_v21  ;;  %v2219_v62 = vsub.f32 %v4321_v57, %v2163_v60  ;;  %v2248_v57 = vpop.permute.xlu1 %2247 }
 0x4e3   : > { %v2212_v5 = vsub.f32 %v2204_v14, %v2208_v31  ;;  %v2215_v3 = vmax.f32 %v2211_v40, 0.0  ;;  %v2205_v26 = vmul.f32 0.0625, %v2201_v19  ;;  %v2220_v43 = vsub.f32 %v4323_v1, %v2164_v58  ;;  %v2283_v14 = vld [vmem:[%s4452_s5] sm:$0xff] }
 0x4e4   : > { %v2226_v36 = vadd.f32 1e-05, %v2214_v50  ;;  %v2221_v54 = vsub.f32 %v4325_v39, %v2165_v21  ;;  %v2260_v39 = vpop.permute.xlu0 %2259 }
 0x4e5   : > { %v2216_v20 = vmax.f32 %v2212_v5, 0.0  ;;  %v2227_v7 = vadd.f32 1e-05, %v2215_v3  ;;  %v2213_v10 = vsub.f32 %v2205_v26, %v2209_v47 }
 0x4e6   : > { %3085 = vrsqrt.f32 %v2226_v36  ;;  %v2264_v29 = vpop.permute.xlu1 %2263 }
 0x4e7   : > { %v2228_v44 = vadd.f32 1e-05, %v2216_v20  ;;  %3087 = vrsqrt.f32 %v2227_v7  ;;  %v2217_v59 = vmax.f32 %v2213_v10, 0.0 }
 0x4e9   : > { %3089 = vrsqrt.f32 %v2228_v44  ;;  %v2229_v52 = vadd.f32 1e-05, %v2217_v59 }
 0x4ea   : > { %v2287_v40 = vpop.permute.xlu1 %2286 }
 0x4eb   : > { %3091 = vrsqrt.f32 %v2229_v52 }
 0x4f0   : > { %v3086_v45 = vpop.eup %3085 }
 0x4f1   : > { %v3088_v15 = vpop.eup %3087  ;;  %v2238_v11 = vmul.f32 %v3086_v45, %v2222_v48  ;;  %v2234_v33 = vmul.f32 %v3086_v45, %v2218_v4 }
 0x4f2   : > { %v2239_v1 = vmul.f32 %v3088_v15, %v2223_v27  ;;  %v2235_v6 = vmul.f32 %v3088_v15, %v2219_v62 }
 0x4f3   : > { %v3090_v53 = vpop.eup %3089  ;;  %v2250_v22 = vmul.f32 %v2244_v18, %v2234_v33  ;;  %v2254_v46 = vmul.f32 %v2248_v57, %v2238_v11 }
 0x4f4   : > { %v2240_v2 = vmul.f32 %v3090_v53, %v2224_v35  ;;  %v2236_v63 = vmul.f32 %v3090_v53, %v2220_v43  ;;  %v2251_v24 = vmul.f32 %v2244_v18, %v2235_v6  ;;  %v2255_v13 = vmul.f32 %v2248_v57, %v2239_v1 }
 0x4f5   : > { %v3092_v61 = vpop.eup %3091  ;;  %v2270_v49 = vadd.f32 %v2264_v29, %v2254_v46  ;;  %v2266_v55 = vadd.f32 %v2260_v39, %v2250_v22 }
 0x4f6   : > { %v2241_v25 = vmul.f32 %v3092_v61, %v2225_v41  ;;  %v2237_v12 = vmul.f32 %v3092_v61, %v2221_v54  ;;  %v2252_v28 = vmul.f32 %v2244_v18, %v2236_v63  ;;  %v2256_v37 = vmul.f32 %v2248_v57, %v2240_v2 }
 0x4f7   : > { %v2271_v51 = vadd.f32 %v2264_v29, %v2255_v13  ;;  %v2278_v17 = vmax.f32 %v2270_v49, 0.0  ;;  %v2267_v42 = vadd.f32 %v2260_v39, %v2251_v24  ;;  %v2274_v32 = vmax.f32 %v2266_v55, 0.0 }
 0x4f8   : > { %v2253_v60 = vmul.f32 %v2244_v18, %v2237_v12  ;;  %v2257_v0 = vmul.f32 %v2248_v57, %v2241_v25  ;;  %v2272_v23 = vadd.f32 %v2264_v29, %v2256_v37  ;;  %v2268_v34 = vadd.f32 %v2260_v39, %v2252_v28 }
 0x4f9   : > { %v2275_v38 = vmax.f32 %v2267_v42, 0.0  ;;  %v2279_v30 = vmax.f32 %v2271_v51, 0.0  ;;  %v2954_v48 = vpack.c.bf16 %v2278_v17, %v2274_v32 }
 0x4fa   : > { %v2273_v58 = vadd.f32 %v2264_v29, %v2257_v0  ;;  %v2280_v8 = vmax.f32 %v2272_v23, 0.0  ;;  %v2269_v16 = vadd.f32 %v2260_v39, %v2253_v60  ;;  %v2276_v56 = vmax.f32 %v2268_v34, 0.0 }
 0x4fb   : > { %v2952_v27 = vpack.c.bf16 %v2279_v30, %v2275_v38 }
 0x4fc   : > { %v2277_v9 = vmax.f32 %v2269_v16, 0.0  ;;  %v2281_v31 = vmax.f32 %v2273_v58, 0.0  ;;  %v2958_v35 = vpack.c.bf16 %v2280_v8, %v2276_v56 }
 0x4fd   : > { %2953 = vmatprep.subr.bf16.mxu0 %v2952_v27 }
 0x4fe   : > { %v2956_v21 = vpack.c.bf16 %v2281_v31, %v2277_v9  ;;  %2955 = vmatpush1.bf16.msra.mxu0 %v2954_v48 }
 0x500   : > { %2957 = vmatprep.subr.bf16.mxu1 %v2956_v21 }
 0x501   : > { %2959 = vmatpush1.bf16.msra.mxu1 %v2958_v35  ;;  %2807 = vmatmul.mubr.msk.f32.vlgmr.msra.gmra.mrb[60].mxu0 %vm2289_vm6, %v2283_v14 }
 0x504   : > { %2808 = vmatmul.mubr.msk.f32.vlgmr.msra.gmra.mrb[60].mxu1 %vm2289_vm6, %v2283_v14 }
 0x5d4   : > { %v2359_v19 = vpop.f32.mrb[60].mxu0 }
 0x5d5   : > { %v4370_v4 = vadd.f32 %v2359_v19, %v2287_v40  ;;  %v2361_v50 = vpop.f32.mrb[61].mxu0 }
 0x5d6   : > { %v4372_v47 = vadd.f32 %v2361_v50, %v2287_v40 }
 0x5d7   : > { %v2435_v41 = vrot.slane %v4370_v4, 4  ;;  %v2464_v62 = vmul.f32 %v4370_v4, %v4370_v4  ;;  %v2430_v5 = vpop.f32.mrb[60].mxu1 }
 0x5d8   : > { %v4377_v3 = vadd.f32 %v2430_v5, %v2287_v40  ;;  %v2441_v26 = vrot.slane %v4372_v47, 4  ;;  %v2465_v43 = vmul.f32 %v4372_v47, %v4372_v47  ;;  %v2432_v36 = vpop.f32.mrb[61].mxu1 }
 0x5d9   : > { %v2436_v54 = vadd.f32 %v2435_v41, %v4370_v4  ;;  %v2468_v20 = vrot.slane %v2464_v62, 4  ;;  %v4383_v7 = vadd.f32 %v2432_v36, %v2287_v40 }
 0x5da   : > { %v2447_v10 = vrot.slane %v4377_v3, 4  ;;  %v2466_v44 = vmul.f32 %v4377_v3, %v4377_v3  ;;  %v2442_v59 = vadd.f32 %v2441_v26, %v4372_v47  ;;  %v2474_v18 = vrot.slane %v2465_v43, 4 }
 0x5db   : > { %v2437_v52 = vrot.slane %v2436_v54, 2  ;;  %v2469_v57 = vadd.f32 %v2468_v20, %v2464_v62  ;;  %v2453_v45 = vrot.slane %v4383_v7, 4  ;;  %v2467_v15 = vmul.f32 %v4383_v7, %v4383_v7 }
 0x5dc   : > { %v2448_v11 = vadd.f32 %v2447_v10, %v4377_v3  ;;  %v2480_v33 = vrot.slane %v2466_v44, 4  ;;  %v2443_v1 = vrot.slane %v2442_v59, 2  ;;  %v2475_v6 = vadd.f32 %v2474_v18, %v2465_v43 }
 0x5dd   : > { %v2438_v29 = vadd.f32 %v2437_v52, %v2436_v54  ;;  %v2470_v39 = vrot.slane %v2469_v57, 2  ;;  %v2454_v53 = vadd.f32 %v2453_v45, %v4383_v7  ;;  %v2486_v22 = vrot.slane %v2467_v15, 4 }
 0x5de   : > { %v2449_v46 = vrot.slane %v2448_v11, 2  ;;  %v2481_v2 = vadd.f32 %v2480_v33, %v2466_v44  ;;  %v2444_v63 = vadd.f32 %v2443_v1, %v2442_v59  ;;  %v2476_v24 = vrot.slane %v2475_v6, 2 }
 0x5df   : > { %v2439_v13 = vrot.slane %v2438_v29, 1  ;;  %v2471_v61 = vadd.f32 %v2470_v39, %v2469_v57  ;;  %v2455_v49 = vrot.slane %v2454_v53, 2  ;;  %v2487_v55 = vadd.f32 %v2486_v22, %v2467_v15  ;;  %v2526_v39 = vpop.permute.xlu0 %2525 }
 0x5e0   : > { %v2450_v25 = vadd.f32 %v2449_v46, %v2448_v11  ;;  %v2482_v12 = vrot.slane %v2481_v2, 2  ;;  %v2445_v28 = vrot.slane %v2444_v63, 1  ;;  %v2477_v37 = vadd.f32 %v2476_v24, %v2475_v6 }
 0x5e1   : > { %v2440_v51 = vadd.f32 %v2439_v13, %v2438_v29  ;;  %v2472_v17 = vrot.slane %v2471_v61, 1  ;;  %v2456_v42 = vadd.f32 %v2455_v49, %v2454_v53  ;;  %v2488_v32 = vrot.slane %v2487_v55, 2  ;;  %v2534_v53 = vpop.permute.xlu1 %2533 }
 0x5e2   : > { %v2451_v60 = vrot.slane %v2450_v25, 1  ;;  %v2483_v0 = vadd.f32 %v2482_v12, %v2481_v2  ;;  %v2446_v23 = vadd.f32 %v2445_v28, %v2444_v63  ;;  %v2478_v34 = vrot.slane %v2477_v37, 1 }
 0x5e3   : > { %v2460_v38 = vmul.f32 0.125, %v2440_v51  ;;  %v2473_v30 = vadd.f32 %v2472_v17, %v2471_v61  ;;  %v2457_v48 = vrot.slane %v2456_v42, 1  ;;  %v2489_v58 = vadd.f32 %v2488_v32, %v2487_v55 }
 0x5e4   : > { %v2452_v8 = vadd.f32 %v2451_v60, %v2450_v25  ;;  %v2484_v16 = vrot.slane %v2483_v0, 1  ;;  %v2461_v56 = vmul.f32 0.125, %v2446_v23  ;;  %v2479_v27 = vadd.f32 %v2478_v34, %v2477_v37 }
 0x5e5   : > { %v2492_v9 = vmul.f32 0.125, %v2473_v30  ;;  %v2496_v31 = vmul.f32 %v2460_v38, %v2460_v38  ;;  %v2458_v35 = vadd.f32 %v2457_v48, %v2456_v42  ;;  %v2490_v62 = vrot.slane %v2489_v58, 1  ;;  %v2547_v37 = vpop.permute.xlu1 %2546 }
 0x5e6   : > { %v2462_v21 = vmul.f32 0.125, %v2452_v8  ;;  %v2485_v14 = vadd.f32 %v2484_v16, %v2483_v0  ;;  %v2493_v40 = vmul.f32 0.125, %v2479_v27  ;;  %v2497_v19 = vmul.f32 %v2461_v56, %v2461_v56 }
 0x5e7   : > { %v2500_v50 = vsub.f32 %v2492_v9, %v2496_v31  ;;  %v2463_v41 = vmul.f32 0.125, %v2458_v35  ;;  %v2491_v54 = vadd.f32 %v2490_v62, %v2489_v58  ;;  %v2508_v1 = vsub.f32 %v4370_v4, %v2460_v38 }
 0x5e8   : > { %v2494_v5 = vmul.f32 0.125, %v2485_v14  ;;  %v2498_v26 = vmul.f32 %v2462_v21, %v2462_v21  ;;  %v2501_v43 = vsub.f32 %v2493_v40, %v2497_v19  ;;  %v2509_v29 = vsub.f32 %v4372_v47, %v2461_v56 }
 0x5e9   : > { %v2504_v36 = vmax.f32 %v2500_v50, 0.0  ;;  %v2499_v20 = vmul.f32 %v2463_v41, %v2463_v41  ;;  %v2495_v18 = vmul.f32 0.125, %v2491_v54  ;;  %v2510_v2 = vsub.f32 %v4377_v3, %v2462_v21  ;;  %v2580_v50 = vpop.permute.xlu0 %2579 }
 0x5ea   : > { %v2502_v10 = vsub.f32 %v2494_v5, %v2498_v26  ;;  %v2505_v44 = vmax.f32 %v2501_v43, 0.0  ;;  %v2511_v55 = vsub.f32 %v4383_v7, %v2463_v41 }
 0x5eb   : > { %v2512_v59 = vadd.f32 1e-05, %v2504_v36  ;;  %v2503_v45 = vsub.f32 %v2495_v18, %v2499_v20 }
 0x5ec   : > { %v2506_v52 = vmax.f32 %v2502_v10, 0.0  ;;  %v2513_v57 = vadd.f32 1e-05, %v2505_v44 }
 0x5ed   : > { %3093 = vrsqrt.f32 %v2512_v59  ;;  %v2507_v11 = vmax.f32 %v2503_v45, 0.0 }
 0x5ee   : > { %v2514_v15 = vadd.f32 1e-05, %v2506_v52  ;;  %3095 = vrsqrt.f32 %v2513_v57 }
 0x5ef   : > { %v2515_v33 = vadd.f32 1e-05, %v2507_v11 }
 0x5f0   : > { %3097 = vrsqrt.f32 %v2514_v15 }
 0x5f1   : > { %3099 = vrsqrt.f32 %v2515_v33 }
 0x5f7   : > { %v3094_v6 = vpop.eup %3093 }
 0x5f8   : > { %v3096_v22 = vpop.eup %3095  ;;  %v2520_v46 = vmul.f32 %v3094_v6, %v2508_v1 }
 0x5f9   : > { %v2521_v63 = vmul.f32 %v3096_v22, %v2509_v29 }
 0x5fa   : > { %v3098_v24 = vpop.eup %3097  ;;  %v2528_v13 = vmul.f32 %v2526_v39, %v2520_v46 }
 0x5fb   : > { %v2522_v61 = vmul.f32 %v3098_v24, %v2510_v2  ;;  %v2529_v49 = vmul.f32 %v2526_v39, %v2521_v63  ;;  %v3100_v12 = vpop.eup %3099  ;;  %v3266_v63 = vmov 1966171168  }
 0x5fc   : > { %v2536_v25 = vadd.f32 %v2534_v53, %v2528_v13  ;;  %v2523_v51 = vmul.f32 %v3100_v12, %v2511_v55  ;;  %v2617_v24 = vunpack.c.l.s4 %v3266_v63  ;;  %v2619_v13 = vlaneseq }
 0x5fd   : > { %v2530_v28 = vmul.f32 %v2526_v39, %v2522_v61  ;;  %v2537_v4 = vadd.f32 %v2534_v53, %v2529_v49 }
 0x5fe   : > { %v2540_v47 = vmax.f32 %v2536_v25, 0.0  ;;  %v2531_v32 = vmul.f32 %v2526_v39, %v2523_v51  ;;  %v2618_v61 = vunpack.c.0.s8 %v2617_v24  ;;  %v2620_v49 = vshrl.u32 %v2619_v13, 7 }
 0x5ff   : > { %v2538_v17 = vadd.f32 %v2534_v53, %v2530_v28  ;;  %v2541_v42 = vmax.f32 %v2537_v4, 0.0  ;;  %vm2641_vm7 = vcmp.lt.s32.totalorder %v2619_v13, 512 }
 0x600   : > { %v2549_v60 = vmul.f32 %v2547_v37, %v2540_v47  ;;  %v2539_v23 = vadd.f32 %v2534_v53, %v2531_v32  ;;  %v2621_v28 = vsub.s32 %v2618_v61, %v2620_v49 }
 0x601   : > { %v2542_v0 = vmax.f32 %v2538_v17, 0.0  ;;  %v2550_v3 = vmul.f32 %v2547_v37, %v2541_v42 }
 0x602   : > { %v2553_v34 = vrot.slane %v2549_v60, 4  ;;  %v2543_v48 = vmax.f32 %v2539_v23, 0.0 }
 0x603   : > { %v2551_v38 = vmul.f32 %v2547_v37, %v2542_v0  ;;  %v2559_v30 = vrot.slane %v2550_v3, 4 }
 0x604   : > { %v2554_v58 = vadd.f32 %v2553_v34, %v2549_v60  ;;  %v2552_v16 = vmul.f32 %v2547_v37, %v2543_v48 }
 0x605   : > { %v2560_v7 = vadd.f32 %v2559_v30, %v2550_v3  ;;  %v2565_v8 = vrot.slane %v2551_v38, 4 }
 0x606   : > { %v2555_v56 = vrot.slane %v2554_v58, 2  ;;  %v2571_v31 = vrot.slane %v2552_v16, 4 }
 0x607   : > { %v2561_v27 = vrot.slane %v2560_v7, 2  ;;  %v2566_v9 = vadd.f32 %v2565_v8, %v2551_v38 }
 0x608   : > { %v2556_v35 = vadd.f32 %v2555_v56, %v2554_v58  ;;  %v2572_v40 = vadd.f32 %v2571_v31, %v2552_v16 }
 0x609   : > { %v2567_v21 = vrot.slane %v2566_v9, 2  ;;  %v2562_v14 = vadd.f32 %v2561_v27, %v2560_v7 }
 0x60a   : > { %v2557_v19 = vrot.slane %v2556_v35, 1  ;;  %v2573_v5 = vrot.slane %v2572_v40, 2 }
 0x60b   : > { %v2563_v41 = vrot.slane %v2562_v14, 1  ;;  %v2568_v62 = vadd.f32 %v2567_v21, %v2566_v9 }
 0x60c   : > { %v2558_v26 = vadd.f32 %v2557_v19, %v2556_v35  ;;  %v2574_v54 = vadd.f32 %v2573_v5, %v2572_v40 }
 0x60d   : > { %v2564_v43 = vadd.f32 %v2563_v41, %v2562_v14  ;;  %v2569_v36 = vrot.slane %v2568_v62, 1 }
 0x60e   : > { %v2582_v20 = vadd.f32 %v2580_v50, %v2558_v26  ;;  %v2575_v59 = vrot.slane %v2574_v54, 1 }
 0x60f   : > { %v2570_v10 = vadd.f32 %v2569_v36, %v2568_v62  ;;  %v2583_v44 = vadd.f32 %v2580_v50, %v2564_v43 }
 0x610   : > { %v2809_v18 = vmul.f32 -1.442695, %v2582_v20  ;;  %v2576_v45 = vadd.f32 %v2575_v59, %v2574_v54 }
 0x611   : > { %v2584_v52 = vadd.f32 %v2580_v50, %v2570_v10  ;;  %v2810_v57 = vmul.f32 -1.442695, %v2583_v44 }
 0x612   : > { %3101 = vpow2.f32 %v2809_v18  ;;  %v2585_v11 = vadd.f32 %v2580_v50, %v2576_v45 }
 0x613   : > { %3103 = vpow2.f32 %v2810_v57  ;;  %v2811_v15 = vmul.f32 -1.442695, %v2584_v52 }
 0x614   : > { %v2812_v33 = vmul.f32 -1.442695, %v2585_v11 }
 0x615   : > { %3105 = vpow2.f32 %v2811_v15 }
 0x616   : > { %3107 = vpow2.f32 %v2812_v33 }
 0x61c   : > { %v3102_v1 = vpop.eup %3101 }
 0x61d   : > { %v3104_v6 = vpop.eup %3103  ;;  %v2598_v29 = vadd.f32 1.0, %v3102_v1 }
 0x61e   : > { %v2599_v39 = vadd.f32 1.0, %v3104_v6 }
 0x61f   : > { %v3106_v53 = vpop.eup %3105  ;;  %3109 = vrcp.f32 %v2598_v29 }
 0x620   : > { %v2600_v22 = vadd.f32 1.0, %v3106_v53  ;;  %3111 = vrcp.f32 %v2599_v39  ;;  %v3108_v46 = vpop.eup %3107 }
 0x621   : > { %v2601_v2 = vadd.f32 1.0, %v3108_v46 }
 0x622   : > { %3113 = vrcp.f32 %v2600_v22 }
 0x623   : > { %3115 = vrcp.f32 %v2601_v2 }
 0x629   : > { %v3110_v55 = vpop.eup %3109 }
 0x62a   : > { %v3112_v25 = vpop.eup %3111 }
 0x62b   : > { %v2614_v12 = vcombine.low %v3110_v55, %v3112_v25 }
 0x62c   : > { %v3114_v4 = vpop.eup %3113 }
 0x62d   : > { %v3116_v37 = vpop.eup %3115  ;;  %v2622_v47 = vrot.slane %v2614_v12, %v2621_v28 }
 0x62e   : > { %v2615_v51 = vcombine.low %v3114_v4, %v3116_v37 }
 0x630   : > { %v2629_v17 = vrot.slane %v2615_v51, %v2621_v28 }
 0x632   : > { %v2630_v42 = vcombine.low %v2622_v47, %v2629_v17 }
 0x634   : > { %v2637_v32 = vrot.slane %v2630_v42, %v2621_v28 }
 0x636   : > { %2643 = vst.msk [vmem:[%s356_s23] sm:$0xf] %vm2641_vm7, %v2637_v32 }
 0x637   : > { %3187 = shalt.err (!%p3184_p2)
}
 0x638   : > { %s3188_s19 = scalar_lea.hbm %s4403_s11, 64  ;;  %s3192_s30 = scalar_lea.hbm %s4454_s7, 128 }
 0x639   : > { %p3189_p0 = scmp.ne.s32.totalorder %s4403_s11, %s3188_s19  ;;  %p3193_p10 = scmp.lt.u32.totalorder %s4403_s11, %s4454_s7 }
 0x63a   : > { %p3194_p11 = scmp.lt.u32.totalorder %s3192_s30, %s3188_s19  ;;  %p3196_p4 = scmp.lt.u32.totalorder %s3188_s19, %s4403_s11 }
 0x63b   : > { %p3190_p5 = pnand %p3189_p0, %p4496_p3 }
 0x63c   : > { %p3195_p12 = por %p3194_p11, %p3193_p10 }
 0x63d   : > { %p3191_p6 = pneg %p3190_p5 }
 0x63e   : > { %p3197_p7 = por %p3196_p4, %p3195_p12 }
 0x640   : > { %p3198_p8 = pnand %p3197_p7, %p3191_p6 }
 0x642   : > { %3201 = shalt.err (!%p3198_p8)
}
 0x643   : > { %2968 = dma.vmem_to_hbm [thread:$0]  (%p4496_p3), %s4405_s29, 64, %s4403_s11, %s2645_s18  }
 0x644 PF: > { %s2671_s22 = sand.u32 1, %s3232_s24   ;;  %p4497_p9 = scmp.ne.s32.totalorder %s4471_s13, 0 }
 0x645   : > { %s2672_s23 = scalar_lea.sflag [#allocation5], %s2671_s22 }
 0x646   : > { %p2978_p13 = pnand %p2750_p1, %p4497_p9 }
 0x648   : > { %3227 = dma.done.wait (!%p2978_p13), %s2672_s23, 64  }
 0x649   : > { %3229 = vsyncadd (!%p2978_p13), %s2672_s23, 4294967232  ;;  %s4498_s27 = sld [smem:[#allocation12_spill]]  ;;  %s4499_s17 = sld [smem:[#allocation13_spill]] }
 0x64a   : > { %s4500_s24 = smov %s3236_s25  ;;  %s4501_s25 = smov %s3240_s26 }
 0x64f   : > { %p19_p2 = scmp.ge.s32.totalorder %s4498_s27, 4   ;;  %s4502_s26 = smov %s4499_s17 }
 0x651   :  { %21 = sbr.rel (!%p19_p2) target bundleno = 5 (0x5), region = 120 }
 0x658   :  { %2677 = vsyncpa [#allocation4], 1 }
 0x659   :  { %2679 = vsyncpa [#allocation4 + $0x1], 1 }
 0x65a   :  { %2680 = vsyncpa [#allocation7], 1 }
 0x65b   :  { %2681 = vsyncpa [#allocation5], 1 }
 0x65c   :  { %2683 = vsyncpa [#allocation5 + $0x1], 1 }

</bundles_post_ra>
